<compile_context>
chip_gen: v7x
topology: tpu7x:2x2x1
jax: 0.10.0
libtpu: 0.0.40
codegen_flags: <defaults>
</compile_context>

<pallas_src>
import functools

import jax
import jax.numpy as jnp
from jax.experimental import pallas as pl
from jax.experimental.pallas import tpu as pltpu  # noqa: F401  (not needed for this grid-less kernel)


def _fused_kernel(*refs, L, T, Np, Hp, Ip, has_h0):
    """Whole forward pass in one invocation, everything resident in VMEM.

    refs = ([h0,] x, W_ih^T, W_hh^T, b_cell, W_dec, b_dec, y_out, h_out)
      x     : (Np, L*Ip)  time flattened into lanes; step j = [:, j*Ip:(j+1)*Ip]
      W_dec : (Hp, 2*Hp)  = [W_out^T | W_hh^T]   (fused decoder matmul)
      b_dec : (1, 2*Hp)   = [b_out   | b_ih+b_hh]
      y_out : (Np, T*Hp)  step i = [:, i*Hp:(i+1)*Hp]  (single lane-dense slab)
    """
    if has_h0:
        h0_ref, x_ref, wih_ref, whh_ref, bcell_ref, wdec_ref, bdec_ref, y_ref, h_ref = refs
        h = h0_ref[...]
    else:
        x_ref, wih_ref, whh_ref, bcell_ref, wdec_ref, bdec_ref, y_ref, h_ref = refs
        h = jnp.zeros((Np, Hp), jnp.float32)

    wih = wih_ref[...]
    whh = whh_ref[...]
    b_cell = bcell_ref[...]
    wdec = wdec_ref[...]
    b_dec = bdec_ref[...]

    # Hoist all input projections off the serial path: L independent MXU matmuls
    # with no recurrence dependency (they pipeline back-to-back on the MXU).
    xz = [
        jnp.dot(x_ref[:, j * Ip:(j + 1) * Ip], wih, preferred_element_type=jnp.float32)
        for j in range(L)
    ]

    # Encoder recurrence: one matmul + tanh per step on the critical path.
    # Fully unrolled (L is tiny) so the scheduler sees across steps.
    for j in range(L):
        h = jnp.tanh(xz[j] + jnp.dot(h, whh, preferred_element_type=jnp.float32) + b_cell)

    # Decoder: one fused (Np,Hp)@(Hp,2Hp) matmul per step yields both
    # y_i = fc_out(h_i) and the pre-activation of h_{i+1} = cell(zeros, h_i).
    for i in range(T):
        z = jnp.dot(h, wdec, preferred_element_type=jnp.float32) + b_dec
        y_ref[:, i * Hp:(i + 1) * Hp] = z[:, :Hp]
        h = jnp.tanh(z[:, Hp:])

    h_ref[...] = h


def _round_up(v, m):
    return -(-v // m) * m


def _pad2d(a, rows, cols):
    return jnp.pad(a, ((0, rows - a.shape[0]), (0, cols - a.shape[1])))


def _run_fused_kernel(x, params, h0, max_iter):
    """Returns un-masked decoder outputs y_raw (N, max_iter, H) and final h (N, H)."""
    N, L, I = x.shape
    H = params["w_hh"].shape[0]
    Np, Hp, Ip = _round_up(N, 8), _round_up(H, 128), _round_up(I, 128)
    f32 = jnp.float32

    # Zero-padding is exact: padded weight rows/cols and bias lanes are zero, so
    # padded hidden lanes stay tanh(0)=0 and never contaminate valid lanes;
    # padded batch rows are independent and sliced away.
    wih_p = _pad2d(params["w_ih"].T.astype(f32), Ip, Hp)                      # (Ip, Hp)
    whh_p = _pad2d(params["w_hh"].T.astype(f32), Hp, Hp)                      # (Hp, Hp)
    b_cell = jnp.pad((params["b_ih"] + params["b_hh"]).astype(f32),
                     (0, Hp - H)).reshape(1, Hp)
    wout_p = _pad2d(params["w_out"].T.astype(f32), Hp, Hp)                    # (Hp, Hp)
    b_out = jnp.pad(params["b_out"].astype(f32), (0, Hp - H)).reshape(1, Hp)
    wdec = jnp.concatenate([wout_p, whh_p], axis=1)                           # (Hp, 2Hp)
    bdec = jnp.concatenate([b_out, b_cell], axis=1)                           # (1, 2Hp)

    # Pad x to vreg granularity and flatten time into the lane axis
    # (pure contiguous reshape, no transpose): (N, L, I) -> (Np, L*Ip).
    x_flat = jnp.pad(x.astype(f32),
                     ((0, Np - N), (0, 0), (0, Ip - I))).reshape(Np, L * Ip)

    has_h0 = h0 is not None
    inputs = (x_flat, wih_p, whh_p, b_cell, wdec, bdec)
    if has_h0:
        inputs = (_pad2d(h0.astype(f32), Np, Hp),) + inputs

    kernel = functools.partial(_fused_kernel, L=L, T=max_iter,
                               Np=Np, Hp=Hp, Ip=Ip, has_h0=has_h0)
    y_flat, h_pad = pl.pallas_call(
        kernel,
        out_shape=(jax.ShapeDtypeStruct((Np, max_iter * Hp), f32),
                   jax.ShapeDtypeStruct((Np, Hp), f32)),
    )(*inputs)

    # (Np, T*Hp) -> (Np, T, Hp) is a free row-major reshape; slice off padding.
    y_raw = y_flat.reshape(Np, max_iter, Hp)[:N, :, :H]
    return y_raw, h_pad[:N, :H]


def rnn_many2many_forward(x, params, h0=None, max_iter=10, eos=0.0):
    y, h_final = _run_fused_kernel(x, params, h0, max_iter)

    # ---- EOS detection + masking, mirroring the PyTorch loop:
    # torch.allclose(out[j], eos, atol=1e-6) uses default rtol=1e-5.
    # Samples that never emit EOS keep mask == 0 for the whole sequence
    # (their key never enters eos_map in the PyTorch code), hence v = 0 here.
    atol, rtol = 1e-6, 1e-5
    tol = atol + rtol * jnp.abs(jnp.float32(eos))
    is_eos = jnp.all(jnp.abs(y - eos) <= tol, axis=-1)          # (N, T)
    has_eos = jnp.any(is_eos, axis=1)
    first = jnp.argmax(is_eos, axis=1)
    v = jnp.where(has_eos, first + 1, 0)
    t_idx = jnp.arange(max_iter)
    mask = (t_idx[None, :] < v[:, None]).astype(y.dtype)
    # TODO(synk): PyTorch's early `break` (decoder stops once ALL samples emit EOS,
    # shrinking T) has no static-shape equivalent; we always emit max_iter steps.
    y = y * mask[:, :, None]
    return y, h_final


# ---------------- pure-JAX reference (mirrors the PyTorch forward, no break) ----
def _ref_raw(x, params, max_iter):
    N, L, I = x.shape
    H = params["w_hh"].shape[0]
    h = jnp.zeros((N, H), jnp.float32)
    for j in range(L):
        h = jnp.tanh(x[:, j] @ params["w_ih"].T + params["b_ih"]
                     + h @ params["w_hh"].T + params["b_hh"])
    outs = []
    for _ in range(max_iter):
        outs.append(h @ params["w_out"].T + params["b_out"])
        h = jnp.tanh(params["b_ih"] + h @ params["w_hh"].T + params["b_hh"])
    return jnp.stack(outs, axis=1), h


def _ref_forward(x, params, max_iter, eos):
    y, h = _ref_raw(x, params, max_iter)
    atol, rtol = 1e-6, 1e-5
    tol = atol + rtol * abs(float(eos))
    is_eos = jnp.all(jnp.abs(y - eos) <= tol, axis=-1)
    has_eos = jnp.any(is_eos, axis=1)
    v = jnp.where(has_eos, jnp.argmax(is_eos, axis=1) + 1, 0)
    mask = (jnp.arange(max_iter)[None, :] < v[:, None]).astype(y.dtype)
    return y * mask[:, :, None], h


if __name__ == "__main__":
    N, L, I, H, MAX_ITER = 2, 8, 16, 32, 10
    key = jax.random.PRNGKey(0)
    ks = jax.random.split(key, 7)
    bound = H ** -0.5  # PyTorch default init bound for RNNCell / Linear(H, H)
    params = {
        "w_ih":  jax.random.uniform(ks[0], (H, I), jnp.float32, -bound, bound),
        "w_hh":  jax.random.uniform(ks[1], (H, H), jnp.float32, -bound, bound),
        "b_ih":  jax.random.uniform(ks[2], (H,),   jnp.float32, -bound, bound),
        "b_hh":  jax.random.uniform(ks[3], (H,),   jnp.float32, -bound, bound),
        "w_out": jax.random.uniform(ks[4], (H, H), jnp.float32, -bound, bound),
        "b_out": jax.random.uniform(ks[5], (H,),   jnp.float32, -bound, bound),
    }
    x = jax.random.normal(ks[6], (N, L, I), jnp.float32)

    y, h = rnn_many2many_forward(x, params, max_iter=MAX_ITER, eos=0.0)
    y_raw, h_raw = _run_fused_kernel(x, params, None, MAX_ITER)
    jax.block_until_ready((y, h, y_raw, h_raw))

    y_ref, h_ref = _ref_forward(x, params, MAX_ITER, 0.0)
    y_raw_ref, h_raw_ref = _ref_raw(x, params, MAX_ITER)
    assert y.shape == (N, MAX_ITER, H) and h.shape == (N, H)
    assert jnp.allclose(y_raw, y_raw_ref, atol=1e-5)   # un-masked decoder outputs
    assert jnp.allclose(h_raw, h_raw_ref, atol=1e-5)
    assert jnp.allclose(y, y_ref, atol=1e-5)
    assert jnp.allclose(h, h_ref, atol=1e-5)
    print("KERNEL_OK")
</pallas_src>

<mosaic_0001>
module attributes {stable_mosaic.version = 11 : i64} {
  func.func @_fused_kernel(%arg0: memref<8x1024xf32, #tpu.memory_space<vmem>>, %arg1: memref<128x128xf32, #tpu.memory_space<vmem>>, %arg2: memref<128x128xf32, #tpu.memory_space<vmem>>, %arg3: memref<1x128xf32, #tpu.memory_space<vmem>>, %arg4: memref<128x256xf32, #tpu.memory_space<vmem>>, %arg5: memref<1x256xf32, #tpu.memory_space<vmem>>, %arg6: memref<8x1280xf32, #tpu.memory_space<vmem>>, %arg7: memref<8x128xf32, #tpu.memory_space<vmem>>) attributes {dimension_semantics = [], scalar_prefetch = 0 : i64, scratch_operands = 0 : i64, tpu.core_type = #tpu.core_type<tc>} {
    %cst = arith.constant 0.000000e+00 : f32
    %0 = vector.broadcast %cst : f32 to vector<8x128xf32>
    %c0 = arith.constant 0 : index
    %c0_0 = arith.constant 0 : index
    %1 = vector.load %arg1[%c0, %c0_0] : memref<128x128xf32, #tpu.memory_space<vmem>>, vector<128x128xf32>
    %c0_1 = arith.constant 0 : index
    %c0_2 = arith.constant 0 : index
    %2 = vector.load %arg2[%c0_1, %c0_2] : memref<128x128xf32, #tpu.memory_space<vmem>>, vector<128x128xf32>
    %c0_3 = arith.constant 0 : index
    %c0_4 = arith.constant 0 : index
    %3 = vector.load %arg3[%c0_3, %c0_4] : memref<1x128xf32, #tpu.memory_space<vmem>>, vector<1x128xf32>
    %c0_5 = arith.constant 0 : index
    %c0_6 = arith.constant 0 : index
    %4 = vector.load %arg4[%c0_5, %c0_6] : memref<128x256xf32, #tpu.memory_space<vmem>>, vector<128x256xf32>
    %c0_7 = arith.constant 0 : index
    %c0_8 = arith.constant 0 : index
    %5 = vector.load %arg5[%c0_7, %c0_8] : memref<1x256xf32, #tpu.memory_space<vmem>>, vector<1x256xf32>
    %c0_9 = arith.constant 0 : index
    %c0_10 = arith.constant 0 : index
    %6 = vector.load %arg0[%c0_9, %c0_10] : memref<8x1024xf32, #tpu.memory_space<vmem>>, vector<8x128xf32>
    %cst_11 = arith.constant dense<0.000000e+00> : vector<8x128xf32>
    %7 = tpu.matmul %6, %1, %cst_11 {dimension_numbers = #tpu.dot_dimension_numbers<[1], [0], [0], [1], [0, 0, 1, 1], [], []>} : vector<8x128xf32>, vector<128x128xf32>, vector<8x128xf32> -> vector<8x128xf32>
    %c0_12 = arith.constant 0 : index
    %c128 = arith.constant 128 : index
    %8 = vector.load %arg0[%c0_12, %c128] : memref<8x1024xf32, #tpu.memory_space<vmem>>, vector<8x128xf32>
    %cst_13 = arith.constant dense<0.000000e+00> : vector<8x128xf32>
    %9 = tpu.matmul %8, %1, %cst_13 {dimension_numbers = #tpu.dot_dimension_numbers<[1], [0], [0], [1], [0, 0, 1, 1], [], []>} : vector<8x128xf32>, vector<128x128xf32>, vector<8x128xf32> -> vector<8x128xf32>
    %c0_14 = arith.constant 0 : index
    %c256 = arith.constant 256 : index
    %10 = vector.load %arg0[%c0_14, %c256] : memref<8x1024xf32, #tpu.memory_space<vmem>>, vector<8x128xf32>
    %cst_15 = arith.constant dense<0.000000e+00> : vector<8x128xf32>
    %11 = tpu.matmul %10, %1, %cst_15 {dimension_numbers = #tpu.dot_dimension_numbers<[1], [0], [0], [1], [0, 0, 1, 1], [], []>} : vector<8x128xf32>, vector<128x128xf32>, vector<8x128xf32> -> vector<8x128xf32>
    %c0_16 = arith.constant 0 : index
    %c384 = arith.constant 384 : index
    %12 = vector.load %arg0[%c0_16, %c384] : memref<8x1024xf32, #tpu.memory_space<vmem>>, vector<8x128xf32>
    %cst_17 = arith.constant dense<0.000000e+00> : vector<8x128xf32>
    %13 = tpu.matmul %12, %1, %cst_17 {dimension_numbers = #tpu.dot_dimension_numbers<[1], [0], [0], [1], [0, 0, 1, 1], [], []>} : vector<8x128xf32>, vector<128x128xf32>, vector<8x128xf32> -> vector<8x128xf32>
    %c0_18 = arith.constant 0 : index
    %c512 = arith.constant 512 : index
    %14 = vector.load %arg0[%c0_18, %c512] : memref<8x1024xf32, #tpu.memory_space<vmem>>, vector<8x128xf32>
    %cst_19 = arith.constant dense<0.000000e+00> : vector<8x128xf32>
    %15 = tpu.matmul %14, %1, %cst_19 {dimension_numbers = #tpu.dot_dimension_numbers<[1], [0], [0], [1], [0, 0, 1, 1], [], []>} : vector<8x128xf32>, vector<128x128xf32>, vector<8x128xf32> -> vector<8x128xf32>
    %c0_20 = arith.constant 0 : index
    %c640 = arith.constant 640 : index
    %16 = vector.load %arg0[%c0_20, %c640] : memref<8x1024xf32, #tpu.memory_space<vmem>>, vector<8x128xf32>
    %cst_21 = arith.constant dense<0.000000e+00> : vector<8x128xf32>
    %17 = tpu.matmul %16, %1, %cst_21 {dimension_numbers = #tpu.dot_dimension_numbers<[1], [0], [0], [1], [0, 0, 1, 1], [], []>} : vector<8x128xf32>, vector<128x128xf32>, vector<8x128xf32> -> vector<8x128xf32>
    %c0_22 = arith.constant 0 : index
    %c768 = arith.constant 768 : index
    %18 = vector.load %arg0[%c0_22, %c768] : memref<8x1024xf32, #tpu.memory_space<vmem>>, vector<8x128xf32>
    %cst_23 = arith.constant dense<0.000000e+00> : vector<8x128xf32>
    %19 = tpu.matmul %18, %1, %cst_23 {dimension_numbers = #tpu.dot_dimension_numbers<[1], [0], [0], [1], [0, 0, 1, 1], [], []>} : vector<8x128xf32>, vector<128x128xf32>, vector<8x128xf32> -> vector<8x128xf32>
    %c0_24 = arith.constant 0 : index
    %c896 = arith.constant 896 : index
    %20 = vector.load %arg0[%c0_24, %c896] : memref<8x1024xf32, #tpu.memory_space<vmem>>, vector<8x128xf32>
    %cst_25 = arith.constant dense<0.000000e+00> : vector<8x128xf32>
    %21 = tpu.matmul %20, %1, %cst_25 {dimension_numbers = #tpu.dot_dimension_numbers<[1], [0], [0], [1], [0, 0, 1, 1], [], []>} : vector<8x128xf32>, vector<128x128xf32>, vector<8x128xf32> -> vector<8x128xf32>
    %cst_26 = arith.constant dense<0.000000e+00> : vector<8x128xf32>
    %22 = tpu.matmul %0, %2, %cst_26 {dimension_numbers = #tpu.dot_dimension_numbers<[1], [0], [0], [1], [0, 0, 1, 1], [], []>} : vector<8x128xf32>, vector<128x128xf32>, vector<8x128xf32> -> vector<8x128xf32>
    %23 = arith.addf %7, %22 : vector<8x128xf32>
    %24 = vector.broadcast %3 : vector<1x128xf32> to vector<8x128xf32>
    %25 = arith.addf %23, %24 : vector<8x128xf32>
    %26 = math.tanh %25 : vector<8x128xf32>
    %cst_27 = arith.constant dense<0.000000e+00> : vector<8x128xf32>
    %27 = tpu.matmul %26, %2, %cst_27 {dimension_numbers = #tpu.dot_dimension_numbers<[1], [0], [0], [1], [0, 0, 1, 1], [], []>} : vector<8x128xf32>, vector<128x128xf32>, vector<8x128xf32> -> vector<8x128xf32>
    %28 = arith.addf %9, %27 : vector<8x128xf32>
    %29 = vector.broadcast %3 : vector<1x128xf32> to vector<8x128xf32>
    %30 = arith.addf %28, %29 : vector<8x128xf32>
    %31 = math.tanh %30 : vector<8x128xf32>
    %cst_28 = arith.constant dense<0.000000e+00> : vector<8x128xf32>
    %32 = tpu.matmul %31, %2, %cst_28 {dimension_numbers = #tpu.dot_dimension_numbers<[1], [0], [0], [1], [0, 0, 1, 1], [], []>} : vector<8x128xf32>, vector<128x128xf32>, vector<8x128xf32> -> vector<8x128xf32>
    %33 = arith.addf %11, %32 : vector<8x128xf32>
    %34 = vector.broadcast %3 : vector<1x128xf32> to vector<8x128xf32>
    %35 = arith.addf %33, %34 : vector<8x128xf32>
    %36 = math.tanh %35 : vector<8x128xf32>
    %cst_29 = arith.constant dense<0.000000e+00> : vector<8x128xf32>
    %37 = tpu.matmul %36, %2, %cst_29 {dimension_numbers = #tpu.dot_dimension_numbers<[1], [0], [0], [1], [0, 0, 1, 1], [], []>} : vector<8x128xf32>, vector<128x128xf32>, vector<8x128xf32> -> vector<8x128xf32>
    %38 = arith.addf %13, %37 : vector<8x128xf32>
    %39 = vector.broadcast %3 : vector<1x128xf32> to vector<8x128xf32>
    %40 = arith.addf %38, %39 : vector<8x128xf32>
    %41 = math.tanh %40 : vector<8x128xf32>
    %cst_30 = arith.constant dense<0.000000e+00> : vector<8x128xf32>
    %42 = tpu.matmul %41, %2, %cst_30 {dimension_numbers = #tpu.dot_dimension_numbers<[1], [0], [0], [1], [0, 0, 1, 1], [], []>} : vector<8x128xf32>, vector<128x128xf32>, vector<8x128xf32> -> vector<8x128xf32>
    %43 = arith.addf %15, %42 : vector<8x128xf32>
    %44 = vector.broadcast %3 : vector<1x128xf32> to vector<8x128xf32>
    %45 = arith.addf %43, %44 : vector<8x128xf32>
    %46 = math.tanh %45 : vector<8x128xf32>
    %cst_31 = arith.constant dense<0.000000e+00> : vector<8x128xf32>
    %47 = tpu.matmul %46, %2, %cst_31 {dimension_numbers = #tpu.dot_dimension_numbers<[1], [0], [0], [1], [0, 0, 1, 1], [], []>} : vector<8x128xf32>, vector<128x128xf32>, vector<8x128xf32> -> vector<8x128xf32>
    %48 = arith.addf %17, %47 : vector<8x128xf32>
    %49 = vector.broadcast %3 : vector<1x128xf32> to vector<8x128xf32>
    %50 = arith.addf %48, %49 : vector<8x128xf32>
    %51 = math.tanh %50 : vector<8x128xf32>
    %cst_32 = arith.constant dense<0.000000e+00> : vector<8x128xf32>
    %52 = tpu.matmul %51, %2, %cst_32 {dimension_numbers = #tpu.dot_dimension_numbers<[1], [0], [0], [1], [0, 0, 1, 1], [], []>} : vector<8x128xf32>, vector<128x128xf32>, vector<8x128xf32> -> vector<8x128xf32>
    %53 = arith.addf %19, %52 : vector<8x128xf32>
    %54 = vector.broadcast %3 : vector<1x128xf32> to vector<8x128xf32>
    %55 = arith.addf %53, %54 : vector<8x128xf32>
    %56 = math.tanh %55 : vector<8x128xf32>
    %cst_33 = arith.constant dense<0.000000e+00> : vector<8x128xf32>
    %57 = tpu.matmul %56, %2, %cst_33 {dimension_numbers = #tpu.dot_dimension_numbers<[1], [0], [0], [1], [0, 0, 1, 1], [], []>} : vector<8x128xf32>, vector<128x128xf32>, vector<8x128xf32> -> vector<8x128xf32>
    %58 = arith.addf %21, %57 : vector<8x128xf32>
    %59 = vector.broadcast %3 : vector<1x128xf32> to vector<8x128xf32>
    %60 = arith.addf %58, %59 : vector<8x128xf32>
    %61 = math.tanh %60 : vector<8x128xf32>
    %cst_34 = arith.constant dense<0.000000e+00> : vector<8x256xf32>
    %62 = tpu.matmul %61, %4, %cst_34 {dimension_numbers = #tpu.dot_dimension_numbers<[1], [0], [0], [1], [0, 0, 1, 1], [], []>} : vector<8x128xf32>, vector<128x256xf32>, vector<8x256xf32> -> vector<8x256xf32>
    %63 = vector.broadcast %5 : vector<1x256xf32> to vector<8x256xf32>
    %64 = arith.addf %62, %63 : vector<8x256xf32>
    %65 = vector.extract_strided_slice %64 {offsets = [0, 0], sizes = [8, 128], strides = [1, 1]} : vector<8x256xf32> to vector<8x128xf32>
    %c0_35 = arith.constant 0 : index
    %c0_36 = arith.constant 0 : index
    %66 = vector.load %arg6[%c0_35, %c0_36] : memref<8x1280xf32, #tpu.memory_space<vmem>>, vector<8x128xf32>
    tpu.vector_store %arg6[%c0_35, %c0_36], %65 {strides = array<i32>} : memref<8x1280xf32, #tpu.memory_space<vmem>>, vector<8x128xf32>,
    %67 = vector.extract_strided_slice %64 {offsets = [0, 128], sizes = [8, 128], strides = [1, 1]} : vector<8x256xf32> to vector<8x128xf32>
    %68 = math.tanh %67 : vector<8x128xf32>
    %cst_37 = arith.constant dense<0.000000e+00> : vector<8x256xf32>
    %69 = tpu.matmul %68, %4, %cst_37 {dimension_numbers = #tpu.dot_dimension_numbers<[1], [0], [0], [1], [0, 0, 1, 1], [], []>} : vector<8x128xf32>, vector<128x256xf32>, vector<8x256xf32> -> vector<8x256xf32>
    %70 = vector.broadcast %5 : vector<1x256xf32> to vector<8x256xf32>
    %71 = arith.addf %69, %70 : vector<8x256xf32>
    %72 = vector.extract_strided_slice %71 {offsets = [0, 0], sizes = [8, 128], strides = [1, 1]} : vector<8x256xf32> to vector<8x128xf32>
    %c0_38 = arith.constant 0 : index
    %c128_39 = arith.constant 128 : index
    %73 = vector.load %arg6[%c0_38, %c128_39] : memref<8x1280xf32, #tpu.memory_space<vmem>>, vector<8x128xf32>
    tpu.vector_store %arg6[%c0_38, %c128_39], %72 {strides = array<i32>} : memref<8x1280xf32, #tpu.memory_space<vmem>>, vector<8x128xf32>,
    %74 = vector.extract_strided_slice %71 {offsets = [0, 128], sizes = [8, 128], strides = [1, 1]} : vector<8x256xf32> to vector<8x128xf32>
    %75 = math.tanh %74 : vector<8x128xf32>
    %cst_40 = arith.constant dense<0.000000e+00> : vector<8x256xf32>
    %76 = tpu.matmul %75, %4, %cst_40 {dimension_numbers = #tpu.dot_dimension_numbers<[1], [0], [0], [1], [0, 0, 1, 1], [], []>} : vector<8x128xf32>, vector<128x256xf32>, vector<8x256xf32> -> vector<8x256xf32>
    %77 = vector.broadcast %5 : vector<1x256xf32> to vector<8x256xf32>
    %78 = arith.addf %76, %77 : vector<8x256xf32>
    %79 = vector.extract_strided_slice %78 {offsets = [0, 0], sizes = [8, 128], strides = [1, 1]} : vector<8x256xf32> to vector<8x128xf32>
    %c0_41 = arith.constant 0 : index
    %c256_42 = arith.constant 256 : index
    %80 = vector.load %arg6[%c0_41, %c256_42] : memref<8x1280xf32, #tpu.memory_space<vmem>>, vector<8x128xf32>
    tpu.vector_store %arg6[%c0_41, %c256_42], %79 {strides = array<i32>} : memref<8x1280xf32, #tpu.memory_space<vmem>>, vector<8x128xf32>,
    %81 = vector.extract_strided_slice %78 {offsets = [0, 128], sizes = [8, 128], strides = [1, 1]} : vector<8x256xf32> to vector<8x128xf32>
    %82 = math.tanh %81 : vector<8x128xf32>
    %cst_43 = arith.constant dense<0.000000e+00> : vector<8x256xf32>
    %83 = tpu.matmul %82, %4, %cst_43 {dimension_numbers = #tpu.dot_dimension_numbers<[1], [0], [0], [1], [0, 0, 1, 1], [], []>} : vector<8x128xf32>, vector<128x256xf32>, vector<8x256xf32> -> vector<8x256xf32>
    %84 = vector.broadcast %5 : vector<1x256xf32> to vector<8x256xf32>
    %85 = arith.addf %83, %84 : vector<8x256xf32>
    %86 = vector.extract_strided_slice %85 {offsets = [0, 0], sizes = [8, 128], strides = [1, 1]} : vector<8x256xf32> to vector<8x128xf32>
    %c0_44 = arith.constant 0 : index
    %c384_45 = arith.constant 384 : index
    %87 = vector.load %arg6[%c0_44, %c384_45] : memref<8x1280xf32, #tpu.memory_space<vmem>>, vector<8x128xf32>
    tpu.vector_store %arg6[%c0_44, %c384_45], %86 {strides = array<i32>} : memref<8x1280xf32, #tpu.memory_space<vmem>>, vector<8x128xf32>,
    %88 = vector.extract_strided_slice %85 {offsets = [0, 128], sizes = [8, 128], strides = [1, 1]} : vector<8x256xf32> to vector<8x128xf32>
    %89 = math.tanh %88 : vector<8x128xf32>
    %cst_46 = arith.constant dense<0.000000e+00> : vector<8x256xf32>
    %90 = tpu.matmul %89, %4, %cst_46 {dimension_numbers = #tpu.dot_dimension_numbers<[1], [0], [0], [1], [0, 0, 1, 1], [], []>} : vector<8x128xf32>, vector<128x256xf32>, vector<8x256xf32> -> vector<8x256xf32>
    %91 = vector.broadcast %5 : vector<1x256xf32> to vector<8x256xf32>
    %92 = arith.addf %90, %91 : vector<8x256xf32>
    %93 = vector.extract_strided_slice %92 {offsets = [0, 0], sizes = [8, 128], strides = [1, 1]} : vector<8x256xf32> to vector<8x128xf32>
    %c0_47 = arith.constant 0 : index
    %c512_48 = arith.constant 512 : index
    %94 = vector.load %arg6[%c0_47, %c512_48] : memref<8x1280xf32, #tpu.memory_space<vmem>>, vector<8x128xf32>
    tpu.vector_store %arg6[%c0_47, %c512_48], %93 {strides = array<i32>} : memref<8x1280xf32, #tpu.memory_space<vmem>>, vector<8x128xf32>,
    %95 = vector.extract_strided_slice %92 {offsets = [0, 128], sizes = [8, 128], strides = [1, 1]} : vector<8x256xf32> to vector<8x128xf32>
    %96 = math.tanh %95 : vector<8x128xf32>
    %cst_49 = arith.constant dense<0.000000e+00> : vector<8x256xf32>
    %97 = tpu.matmul %96, %4, %cst_49 {dimension_numbers = #tpu.dot_dimension_numbers<[1], [0], [0], [1], [0, 0, 1, 1], [], []>} : vector<8x128xf32>, vector<128x256xf32>, vector<8x256xf32> -> vector<8x256xf32>
    %98 = vector.broadcast %5 : vector<1x256xf32> to vector<8x256xf32>
    %99 = arith.addf %97, %98 : vector<8x256xf32>
    %100 = vector.extract_strided_slice %99 {offsets = [0, 0], sizes = [8, 128], strides = [1, 1]} : vector<8x256xf32> to vector<8x128xf32>
    %c0_50 = arith.constant 0 : index
    %c640_51 = arith.constant 640 : index
    %101 = vector.load %arg6[%c0_50, %c640_51] : memref<8x1280xf32, #tpu.memory_space<vmem>>, vector<8x128xf32>
    tpu.vector_store %arg6[%c0_50, %c640_51], %100 {strides = array<i32>} : memref<8x1280xf32, #tpu.memory_space<vmem>>, vector<8x128xf32>,
    %102 = vector.extract_strided_slice %99 {offsets = [0, 128], sizes = [8, 128], strides = [1, 1]} : vector<8x256xf32> to vector<8x128xf32>
    %103 = math.tanh %102 : vector<8x128xf32>
    %cst_52 = arith.constant dense<0.000000e+00> : vector<8x256xf32>
    %104 = tpu.matmul %103, %4, %cst_52 {dimension_numbers = #tpu.dot_dimension_numbers<[1], [0], [0], [1], [0, 0, 1, 1], [], []>} : vector<8x128xf32>, vector<128x256xf32>, vector<8x256xf32> -> vector<8x256xf32>
    %105 = vector.broadcast %5 : vector<1x256xf32> to vector<8x256xf32>
    %106 = arith.addf %104, %105 : vector<8x256xf32>
    %107 = vector.extract_strided_slice %106 {offsets = [0, 0], sizes = [8, 128], strides = [1, 1]} : vector<8x256xf32> to vector<8x128xf32>
    %c0_53 = arith.constant 0 : index
    %c768_54 = arith.constant 768 : index
    %108 = vector.load %arg6[%c0_53, %c768_54] : memref<8x1280xf32, #tpu.memory_space<vmem>>, vector<8x128xf32>
    tpu.vector_store %arg6[%c0_53, %c768_54], %107 {strides = array<i32>} : memref<8x1280xf32, #tpu.memory_space<vmem>>, vector<8x128xf32>,
    %109 = vector.extract_strided_slice %106 {offsets = [0, 128], sizes = [8, 128], strides = [1, 1]} : vector<8x256xf32> to vector<8x128xf32>
    %110 = math.tanh %109 : vector<8x128xf32>
    %cst_55 = arith.constant dense<0.000000e+00> : vector<8x256xf32>
    %111 = tpu.matmul %110, %4, %cst_55 {dimension_numbers = #tpu.dot_dimension_numbers<[1], [0], [0], [1], [0, 0, 1, 1], [], []>} : vector<8x128xf32>, vector<128x256xf32>, vector<8x256xf32> -> vector<8x256xf32>
    %112 = vector.broadcast %5 : vector<1x256xf32> to vector<8x256xf32>
    %113 = arith.addf %111, %112 : vector<8x256xf32>
    %114 = vector.extract_strided_slice %113 {offsets = [0, 0], sizes = [8, 128], strides = [1, 1]} : vector<8x256xf32> to vector<8x128xf32>
    %c0_56 = arith.constant 0 : index
    %c896_57 = arith.constant 896 : index
    %115 = vector.load %arg6[%c0_56, %c896_57] : memref<8x1280xf32, #tpu.memory_space<vmem>>, vector<8x128xf32>
    tpu.vector_store %arg6[%c0_56, %c896_57], %114 {strides = array<i32>} : memref<8x1280xf32, #tpu.memory_space<vmem>>, vector<8x128xf32>,
    %116 = vector.extract_strided_slice %113 {offsets = [0, 128], sizes = [8, 128], strides = [1, 1]} : vector<8x256xf32> to vector<8x128xf32>
    %117 = math.tanh %116 : vector<8x128xf32>
    %cst_58 = arith.constant dense<0.000000e+00> : vector<8x256xf32>
    %118 = tpu.matmul %117, %4, %cst_58 {dimension_numbers = #tpu.dot_dimension_numbers<[1], [0], [0], [1], [0, 0, 1, 1], [], []>} : vector<8x128xf32>, vector<128x256xf32>, vector<8x256xf32> -> vector<8x256xf32>
    %119 = vector.broadcast %5 : vector<1x256xf32> to vector<8x256xf32>
    %120 = arith.addf %118, %119 : vector<8x256xf32>
    %121 = vector.extract_strided_slice %120 {offsets = [0, 0], sizes = [8, 128], strides = [1, 1]} : vector<8x256xf32> to vector<8x128xf32>
    %c0_59 = arith.constant 0 : index
    %c1024 = arith.constant 1024 : index
    %122 = vector.load %arg6[%c0_59, %c1024] : memref<8x1280xf32, #tpu.memory_space<vmem>>, vector<8x128xf32>
    tpu.vector_store %arg6[%c0_59, %c1024], %121 {strides = array<i32>} : memref<8x1280xf32, #tpu.memory_space<vmem>>, vector<8x128xf32>,
    %123 = vector.extract_strided_slice %120 {offsets = [0, 128], sizes = [8, 128], strides = [1, 1]} : vector<8x256xf32> to vector<8x128xf32>
    %124 = math.tanh %123 : vector<8x128xf32>
    %cst_60 = arith.constant dense<0.000000e+00> : vector<8x256xf32>
    %125 = tpu.matmul %124, %4, %cst_60 {dimension_numbers = #tpu.dot_dimension_numbers<[1], [0], [0], [1], [0, 0, 1, 1], [], []>} : vector<8x128xf32>, vector<128x256xf32>, vector<8x256xf32> -> vector<8x256xf32>
    %126 = vector.broadcast %5 : vector<1x256xf32> to vector<8x256xf32>
    %127 = arith.addf %125, %126 : vector<8x256xf32>
    %128 = vector.extract_strided_slice %127 {offsets = [0, 0], sizes = [8, 128], strides = [1, 1]} : vector<8x256xf32> to vector<8x128xf32>
    %c0_61 = arith.constant 0 : index
    %c1152 = arith.constant 1152 : index
    %129 = vector.load %arg6[%c0_61, %c1152] : memref<8x1280xf32, #tpu.memory_space<vmem>>, vector<8x128xf32>
    tpu.vector_store %arg6[%c0_61, %c1152], %128 {strides = array<i32>} : memref<8x1280xf32, #tpu.memory_space<vmem>>, vector<8x128xf32>,
    %130 = vector.extract_strided_slice %127 {offsets = [0, 128], sizes = [8, 128], strides = [1, 1]} : vector<8x256xf32> to vector<8x128xf32>
    %131 = math.tanh %130 : vector<8x128xf32>
    %c0_62 = arith.constant 0 : index
    %c0_63 = arith.constant 0 : index
    %132 = vector.load %arg7[%c0_62, %c0_63] : memref<8x128xf32, #tpu.memory_space<vmem>>, vector<8x128xf32>
    tpu.vector_store %arg7[%c0_62, %c0_63], %131 {strides = array<i32>} : memref<8x128xf32, #tpu.memory_space<vmem>>, vector<8x128xf32>,
    return
  }
}

</mosaic_0001>

<bundles_post_ra>
// kernel: tpu_custom_call.1
= control target key start
LH: loop header
LB: loop body
LE: loop exit
PB: predicated region body
PF: predicated region fallthrough
CT: control target
= control target key end

     0   :  { %13 = vsyncpa [#allocation3], 0  ;;  %s4491_s0 = inlined_call_operand.hbm [shape: f32[8,1024], index: 0, kind: input, shape index: {}]   ;;  %s4492_s1 = inlined_call_operand.hbm [shape: f32[128,128], index: 1, kind: input, shape index: {}]   ;;  %s4493_s2 = inlined_call_operand.hbm [shape: f32[128,128], index: 2, kind: input, shape index: {}]   ;;  %s4494_s3 = inlined_call_operand.vmem [shape: f32[1,128], index: 3, kind: input, shape index: {}]   ;;  %s4495_s4 = inlined_call_operand.hbm [shape: f32[128,256], index: 4, kind: input, shape index: {}]   ;;  %s4496_s5 = inlined_call_operand.vmem [shape: f32[1,256], index: 5, kind: input, shape index: {}]   ;;  %s4497_s6 = inlined_call_operand.hbm [shape: f32[8,1280], index: 6, kind: output, shape index: {0}]   ;;  %s4498_s7 = inlined_call_operand.hbm [shape: f32[8,128], index: 7, kind: output, shape index: {1}]  }
   0x1   :  { %14 = vsyncpa [#allocation6], 0 }
   0x2   :  { %15 = vsyncpa [#allocation9], 0 }
   0x3   :  { %16 = vsyncpa [#allocation4], 0 }
   0x4   :  { %17 = vsyncpa [#allocation12], 0  ;;  %s3797_s24 = smov [#allocation5]   ;;  %s3655_s28 = scalar_lea.hbm %s4492_s1, 2048 }
   0x5   :  { %s33_s25 = sshll.u32 %s3797_s24, 4  ;;  %p3656_p0 = scmp.ne.s32.totalorder %s4492_s1, %s3655_s28  ;;  %s34_s25 = int_to_ptr.vmem [resolvable:$true] %s33_s25 }
   0x6   :  { %p3659_p1 = scmp.lt.u32.totalorder %s3655_s28, %s4492_s1 }
   0x8   :  { %p3661_p2 = pnand %p3659_p1, %p3656_p0 }
   0xa   :  { %3664 = shalt.err (!%p3661_p2)
}
   0xb   :  { %s3665_s10 = scalar_lea.vmem %s34_s25, 2048  ;;  %p3670_p4 = scmp.lt.s32.totalorder %s34_s25, %s34_s25 }
   0xc   :  { %p3666_p3 = scmp.ne.s32.totalorder %s34_s25, %s3665_s10  ;;  %p3671_p5 = scmp.lt.s32.totalorder %s3665_s10, %s3665_s10 }
   0xe   :  { %p3672_p6 = por %p3671_p5, %p3670_p4 }
  0x10   :  { %p3673_p7 = pnand %p3672_p6, %p3666_p3 }
  0x12   :  { %3676 = shalt.err (!%p3673_p7)
}
  0x13   :  { %s3798_s11 = smov 128   ;;  %s3799_s12 = smov 8  }
  0x14   :  { %39 = dma.hbm_to_vmem [thread:$0]  %s4492_s1, 2048, %s34_s25, [#allocation6], %s3798_s11, %s3798_s11, %s3799_s12  }
  0x15   :  { %s3800_s15 = smov [#allocation2]   ;;  %s3801_s17 = smov [#allocation7]  }
  0x16   :  { %s24_s16 = sshll.u32 %s3800_s15, 4  ;;  %s45_s18 = sshll.u32 %s3801_s17, 4  ;;  %s25_s16 = int_to_ptr.vmem [resolvable:$true] %s24_s16  ;;  %s46_s18 = int_to_ptr.vmem [resolvable:$true] %s45_s18 }
  0x17   :  { %s3677_s21 = scalar_lea.hbm %s4491_s0, 1024 }
  0x18   :  { %p3678_p8 = scmp.ne.s32.totalorder %s4491_s0, %s3677_s21  ;;  %p3681_p9 = scmp.lt.u32.totalorder %s3677_s21, %s4491_s0 }
  0x1a   :  { %p3683_p10 = pnand %p3681_p9, %p3678_p8 }
  0x1c   :  { %3686 = shalt.err (!%p3683_p10)
}
  0x1d   :  { %s3687_s1 = scalar_lea.vmem %s25_s16, 1024  ;;  %p3692_p12 = scmp.lt.s32.totalorder %s25_s16, %s25_s16 }
  0x1e   :  { %p3688_p11 = scmp.ne.s32.totalorder %s25_s16, %s3687_s1  ;;  %p3693_p13 = scmp.lt.s32.totalorder %s3687_s1, %s3687_s1 }
  0x20   :  { %p3694_p0 = por %p3693_p13, %p3692_p12 }
  0x22   :  { %p3695_p1 = pnand %p3694_p0, %p3688_p11 }
  0x24   :  { %3698 = shalt.err (!%p3695_p1)
}
  0x25   :  { %27 = dma.hbm_to_vmem [thread:$0]  %s4491_s0, 1024, %s25_s16, [#allocation3]  }
  0x26   :  { %s3699_s30 = scalar_lea.hbm %s4493_s2, 2048 }
  0x27   :  { %p3700_p2 = scmp.ne.s32.totalorder %s4493_s2, %s3699_s30  ;;  %p3703_p3 = scmp.lt.u32.totalorder %s3699_s30, %s4493_s2 }
  0x29   :  { %p3705_p4 = pnand %p3703_p3, %p3700_p2 }
  0x2b   :  { %3708 = shalt.err (!%p3705_p4)
}
  0x2c   :  { %s3709_s14 = scalar_lea.vmem %s46_s18, 2048  ;;  %p3714_p6 = scmp.lt.s32.totalorder %s46_s18, %s46_s18 }
  0x2d   :  { %p3710_p5 = scmp.ne.s32.totalorder %s46_s18, %s3709_s14  ;;  %p3715_p7 = scmp.lt.s32.totalorder %s3709_s14, %s3709_s14 }
  0x2f   :  { %p3716_p8 = por %p3715_p7, %p3714_p6 }
  0x31   :  { %p3717_p9 = pnand %p3716_p8, %p3710_p5 }
  0x33   :  { %3720 = shalt.err (!%p3717_p9)
}
  0x34   :  { %51 = dma.hbm_to_vmem [thread:$0]  %s4493_s2, 2048, %s46_s18, [#allocation6], %s3798_s11, %s3798_s11, %s3799_s12  }
  0x35   :  { %s3802_s16 = smov [#allocation8]   ;;  %s3721_s21 = scalar_lea.hbm %s4495_s4, 4096 }
  0x36   :  { %s59_s17 = sshll.u32 %s3802_s16, 4  ;;  %p3722_p10 = scmp.ne.s32.totalorder %s4495_s4, %s3721_s21  ;;  %s60_s17 = int_to_ptr.vmem [resolvable:$true] %s59_s17 }
  0x37   :  { %p3725_p11 = scmp.lt.u32.totalorder %s3721_s21, %s4495_s4 }
  0x39   :  { %p3727_p12 = pnand %p3725_p11, %p3722_p10 }
  0x3b   :  { %3730 = shalt.err (!%p3727_p12)
}
  0x3c   :  { %s3731_s1 = scalar_lea.vmem %s60_s17, 4096  ;;  %p3736_p0 = scmp.lt.s32.totalorder %s60_s17, %s60_s17 }
  0x3d   :  { %p3732_p13 = scmp.ne.s32.totalorder %s60_s17, %s3731_s1  ;;  %p3737_p1 = scmp.lt.s32.totalorder %s3731_s1, %s3731_s1 }
  0x3f   :  { %p3738_p2 = por %p3737_p1, %p3736_p0 }
  0x41   :  { %p3739_p3 = pnand %p3738_p2, %p3732_p13 }
  0x43   :  { %3742 = shalt.err (!%p3739_p3)
}
  0x44   :  { %s3803_s2 = smov 256   ;;  %s3804_s11 = smov 16  }
  0x45   :  { %65 = dma.hbm_to_vmem [thread:$0]  %s4495_s4, 4096, %s60_s17, [#allocation9], %s3803_s2, %s3803_s2, %s3804_s11  }
  0x46   :  { %3787 = dma.done.wait [#allocation3], 1024  }
  0x47   :  { %3788 = vsyncadd [#allocation3], 4294966272 }
  0x48   :  { %3789 = dma.done.wait [#allocation6], 4096  }
  0x49   :  { %3790 = vsyncadd [#allocation6], 4294963200 }
  0x4a   :  { %3791 = dma.done.wait [#allocation9], 4096  }
  0x4b   :  { %3792 = vsyncadd [#allocation9], 4294963200  ;;  %v3805_v0 = vmov 0.0|0.0   ;;  %vm3806_vm0 = vmmov 0   ;;  %v3807_v1 = vmov 0.0   ;;  %v96_v2 = vld [vmem:[#allocation7] sm:$0xff] }
  0x4c   :  { %2902 = vmatprep.subr.bf16.mxu0 %v3805_v0  ;;  %2926 = vmatprep.subr.bf16.mxu1 %v3805_v0  ;;  %v97_v3 = vld [vmem:[#allocation7 + $0x8] sm:$0xff]  ;;  %v80_v4 = vld [vmem:[#allocation5] sm:$0xff]  ;;  %v98_v7 = vld [vmem:[#allocation7 + $0x10] sm:$0xff] }
  0x4d   :  { %2374 = vmatprep.mubr.msk.f32.mxu0 %vm3806_vm0, %v3807_v1  ;;  %2409 = vmatprep.mubr.msk.f32.mxu1 %vm3806_vm0, %v3807_v1  ;;  %v3910_v5 = vpack.c.bf16 %v97_v3, %v96_v2  ;;  %v81_v6 = vld [vmem:[#allocation5 + $0x8] sm:$0xff]  ;;  %v99_v8 = vld [vmem:[#allocation7 + $0x18] sm:$0xff]  ;;  %v82_v10 = vld [vmem:[#allocation5 + $0x10] sm:$0xff] }
  0x4e   :  { %v3912_v9 = vpack.c.bf16 %v81_v6, %v80_v4  ;;  %v83_v11 = vld [vmem:[#allocation5 + $0x18] sm:$0xff]  ;;  %v3915_v12 = vpack.c.bf16 %v99_v8, %v98_v7  ;;  %v100_v14 = vld [vmem:[#allocation7 + $0x20] sm:$0xff]  ;;  %v101_v15 = vld [vmem:[#allocation7 + $0x28] sm:$0xff] }
  0x4f   :  { %2904 = vmatpush3.bf16.msra.mxu0 %v3910_v5  ;;  %v3919_v13 = vpack.c.bf16 %v83_v11, %v82_v10  ;;  %v84_v16 = vld [vmem:[#allocation5 + $0x20] sm:$0xff]  ;;  %v85_v17 = vld [vmem:[#allocation5 + $0x28] sm:$0xff]  ;;  %v3923_v18 = vpack.c.bf16 %v101_v15, %v100_v14  ;;  %v102_v20 = vld [vmem:[#allocation7 + $0x30] sm:$0xff] }
  0x50   :  { %2928 = vmatpush3.bf16.msra.mxu1 %v3912_v9  ;;  %2905 = vmatprep.subr.bf16.mxu0 %v3805_v0  ;;  %v3927_v19 = vpack.c.bf16 %v85_v17, %v84_v16  ;;  %v103_v21 = vld [vmem:[#allocation7 + $0x38] sm:$0xff]  ;;  %v86_v22 = vld [vmem:[#allocation5 + $0x30] sm:$0xff]  ;;  %v104_v26 = vld [vmem:[#allocation7 + $0x40] sm:$0xff] }
  0x51   :  { %2929 = vmatprep.subr.bf16.mxu1 %v3805_v0  ;;  %v87_v23 = vld [vmem:[#allocation5 + $0x38] sm:$0xff]  ;;  %v3931_v24 = vpack.c.bf16 %v103_v21, %v102_v20  ;;  %v105_v27 = vld [vmem:[#allocation7 + $0x48] sm:$0xff]  ;;  %v88_v28 = vld [vmem:[#allocation5 + $0x40] sm:$0xff] }
  0x52   :  { %v3935_v25 = vpack.c.bf16 %v87_v23, %v86_v22  ;;  %v89_v29 = vld [vmem:[#allocation5 + $0x48] sm:$0xff]  ;;  %v3939_v30 = vpack.c.bf16 %v105_v27, %v104_v26  ;;  %v106_v32 = vld [vmem:[#allocation7 + $0x50] sm:$0xff]  ;;  %v107_v33 = vld [vmem:[#allocation7 + $0x58] sm:$0xff] }
  0x53   :  { %2907 = vmatpush3.bf16.msra.mxu0 %v3915_v12  ;;  %v3943_v31 = vpack.c.bf16 %v89_v29, %v88_v28  ;;  %v90_v34 = vld [vmem:[#allocation5 + $0x50] sm:$0xff]  ;;  %v91_v35 = vld [vmem:[#allocation5 + $0x58] sm:$0xff]  ;;  %v3947_v36 = vpack.c.bf16 %v107_v33, %v106_v32  ;;  %v108_v38 = vld [vmem:[#allocation7 + $0x60] sm:$0xff] }
  0x54   :  { %2931 = vmatpush3.bf16.msra.mxu1 %v3919_v13  ;;  %2908 = vmatprep.subr.bf16.mxu0 %v3805_v0  ;;  %v3951_v37 = vpack.c.bf16 %v91_v35, %v90_v34  ;;  %v109_v39 = vld [vmem:[#allocation7 + $0x68] sm:$0xff]  ;;  %v92_v40 = vld [vmem:[#allocation5 + $0x60] sm:$0xff]  ;;  %v110_v44 = vld [vmem:[#allocation7 + $0x70] sm:$0xff] }
  0x55   :  { %2932 = vmatprep.subr.bf16.mxu1 %v3805_v0  ;;  %v93_v41 = vld [vmem:[#allocation5 + $0x68] sm:$0xff]  ;;  %v3955_v42 = vpack.c.bf16 %v109_v39, %v108_v38  ;;  %v111_v45 = vld [vmem:[#allocation7 + $0x78] sm:$0xff]  ;;  %v94_v46 = vld [vmem:[#allocation5 + $0x70] sm:$0xff] }
  0x56   :  { %v3959_v43 = vpack.c.bf16 %v93_v41, %v92_v40  ;;  %v95_v47 = vld [vmem:[#allocation5 + $0x78] sm:$0xff]  ;;  %v3963_v48 = vpack.c.bf16 %v111_v45, %v110_v44  ;;  %v146_v50 = vld [vmem:[#allocation2] sm:$0xff]  ;;  %v147_v51 = vld [vmem:[#allocation2 + $0x8] sm:$0xff] }
  0x57   :  { %2910 = vmatpush3.bf16.msra.mxu0 %v3923_v18  ;;  %v3967_v49 = vpack.c.bf16 %v95_v47, %v94_v46  ;;  %v4032_v53 = vld [vmem:[%s4494_s3] ss:$0 sm:$0xff]  ;;  %v148_v62 = vld [vmem:[#allocation2 + $0x10] sm:$0xff]  ;;  %v149_v10 = vld [vmem:[#allocation2 + $0x18] sm:$0xff] }
  0x58   :  { %2934 = vmatpush3.bf16.msra.mxu1 %v3927_v19  ;;  %2911 = vmatprep.subr.bf16.mxu0 %v3805_v0  ;;  %v150_v22 = vld [vmem:[#allocation2 + $0x20] sm:$0xff]  ;;  %v151_v34 = vld [vmem:[#allocation2 + $0x28] sm:$0xff]  ;;  %v152_v46 = vld [vmem:[#allocation2 + $0x30] sm:$0xff] }
  0x59   :  { %2935 = vmatprep.subr.bf16.mxu1 %v3805_v0 }
  0x5b   :  { %2913 = vmatpush3.bf16.msra.mxu0 %v3931_v24 }
  0x5c   :  { %2937 = vmatpush3.bf16.msra.mxu1 %v3935_v25  ;;  %2914 = vmatprep.subr.bf16.mxu0 %v3805_v0 }
  0x5d   :  { %2938 = vmatprep.subr.bf16.mxu1 %v3805_v0 }
  0x5f   :  { %2916 = vmatpush3.bf16.msra.mxu0 %v3939_v30 }
  0x60   :  { %2940 = vmatpush3.bf16.msra.mxu1 %v3943_v31  ;;  %2917 = vmatprep.subr.bf16.mxu0 %v3805_v0 }
  0x61   :  { %2941 = vmatprep.subr.bf16.mxu1 %v3805_v0 }
  0x63   :  { %2919 = vmatpush3.bf16.msra.mxu0 %v3947_v36 }
  0x64   :  { %2943 = vmatpush3.bf16.msra.mxu1 %v3951_v37  ;;  %2920 = vmatprep.subr.bf16.mxu0 %v3805_v0 }
  0x65   :  { %2944 = vmatprep.subr.bf16.mxu1 %v3805_v0 }
  0x67   :  { %2922 = vmatpush3.bf16.msra.mxu0 %v3955_v42 }
  0x68   :  { %2946 = vmatpush3.bf16.msra.mxu1 %v3959_v43  ;;  %2923 = vmatprep.subr.bf16.mxu0 %v3805_v0 }
  0x69   :  { %2947 = vmatprep.subr.bf16.mxu1 %v3805_v0 }
  0x6b   :  { %2925 = vmatpush3.bf16.msra.mxu0 %v3963_v48 }
  0x6c   :  { %2949 = vmatpush3.bf16.msra.mxu1 %v3967_v49  ;;  %2950 = vmatprep.subr.bf16.mxu0 %v3805_v0 }
  0x6d   :  { %2974 = vmatprep.subr.bf16.mxu1 %v3805_v0 }
  0x6e   :  { %2375 = vmatmul.mubr.f32.vlgmr.msra.gmra.mrb[0].mxu0 %v3807_v1 }
  0x6f   :  { %2410 = vmatmul.mubr.f32.vlgmr.msra.gmra.mrb[0].mxu1 %v146_v50  ;;  %2952 = vmatpush3.bf16.msra.mxu0 %v3910_v5 }
  0x70   :  { %2976 = vmatpush3.bf16.msra.mxu1 %v3912_v9  ;;  %2953 = vmatprep.subr.bf16.mxu0 %v3805_v0 }
  0x71   :  { %2977 = vmatprep.subr.bf16.mxu1 %v3805_v0  ;;  %2479 = vmatprep.mubr.msk.f32.mxu1 %vm3806_vm0, %v3807_v1 }
  0x72   :  { %2444 = vmatprep.mubr.msk.f32.mxu0 %vm3806_vm0, %v3807_v1 }
  0x73   :  { %2955 = vmatpush3.bf16.msra.mxu0 %v3915_v12 }
  0x74   :  { %2979 = vmatpush3.bf16.msra.mxu1 %v3919_v13  ;;  %2956 = vmatprep.subr.bf16.mxu0 %v3805_v0 }
  0x75   :  { %2980 = vmatprep.subr.bf16.mxu1 %v3805_v0 }
  0x77   :  { %2958 = vmatpush3.bf16.msra.mxu0 %v3923_v18 }
  0x78   :  { %2982 = vmatpush3.bf16.msra.mxu1 %v3927_v19  ;;  %2959 = vmatprep.subr.bf16.mxu0 %v3805_v0 }
  0x79   :  { %2983 = vmatprep.subr.bf16.mxu1 %v3805_v0 }
  0x7b   :  { %2961 = vmatpush3.bf16.msra.mxu0 %v3931_v24 }
  0x7c   :  { %2985 = vmatpush3.bf16.msra.mxu1 %v3935_v25  ;;  %2962 = vmatprep.subr.bf16.mxu0 %v3805_v0 }
  0x7d   :  { %2986 = vmatprep.subr.bf16.mxu1 %v3805_v0 }
  0x7f   :  { %2964 = vmatpush3.bf16.msra.mxu0 %v3939_v30 }
  0x80   :  { %2988 = vmatpush3.bf16.msra.mxu1 %v3943_v31  ;;  %2965 = vmatprep.subr.bf16.mxu0 %v3805_v0 }
  0x81   :  { %2989 = vmatprep.subr.bf16.mxu1 %v3805_v0 }
  0x83   :  { %2967 = vmatpush3.bf16.msra.mxu0 %v3947_v36 }
  0x84   :  { %2991 = vmatpush3.bf16.msra.mxu1 %v3951_v37  ;;  %2968 = vmatprep.subr.bf16.mxu0 %v3805_v0 }
  0x85   :  { %2992 = vmatprep.subr.bf16.mxu1 %v3805_v0 }
  0x87   :  { %2970 = vmatpush3.bf16.msra.mxu0 %v3955_v42 }
  0x88   :  { %2994 = vmatpush3.bf16.msra.mxu1 %v3959_v43  ;;  %2971 = vmatprep.subr.bf16.mxu0 %v3805_v0 }
  0x89   :  { %2995 = vmatprep.subr.bf16.mxu1 %v3805_v0 }
  0x8b   :  { %2973 = vmatpush3.bf16.msra.mxu0 %v3963_v48 }
  0x8c   :  { %2997 = vmatpush3.bf16.msra.mxu1 %v3967_v49  ;;  %2998 = vmatprep.subr.bf16.mxu0 %v3805_v0 }
  0x8d   :  { %3022 = vmatprep.subr.bf16.mxu1 %v3805_v0 }
  0x8f   :  { %2480 = vmatmul.mubr.f32.vlgmr.msra.gmra.mrb[2].mxu1 %v147_v51  ;;  %v122_v51 = vld [vmem:[#allocation8 + $0x48] sm:$0xff] }
  0x90   :  { %3024 = vmatpush3.bf16.msra.mxu1 %v3912_v9  ;;  %2549 = vmatprep.mubr.msk.f32.mxu1 %vm3806_vm0, %v3807_v1 }
  0x91   :  { %3025 = vmatprep.subr.bf16.mxu1 %v3805_v0 }
  0x94   :  { %3027 = vmatpush3.bf16.msra.mxu1 %v3919_v13 }
  0x95   :  { %3028 = vmatprep.subr.bf16.mxu1 %v3805_v0 }
  0x98   :  { %3030 = vmatpush3.bf16.msra.mxu1 %v3927_v19 }
  0x99   :  { %3031 = vmatprep.subr.bf16.mxu1 %v3805_v0 }
  0x9c   :  { %3033 = vmatpush3.bf16.msra.mxu1 %v3935_v25 }
  0x9d   :  { %3034 = vmatprep.subr.bf16.mxu1 %v3805_v0 }
  0xa0   :  { %3036 = vmatpush3.bf16.msra.mxu1 %v3943_v31 }
  0xa1   :  { %3037 = vmatprep.subr.bf16.mxu1 %v3805_v0 }
  0xa4   :  { %3039 = vmatpush3.bf16.msra.mxu1 %v3951_v37 }
  0xa5   :  { %3040 = vmatprep.subr.bf16.mxu1 %v3805_v0 }
  0xa8   :  { %3042 = vmatpush3.bf16.msra.mxu1 %v3959_v43 }
  0xa9   :  { %3043 = vmatprep.subr.bf16.mxu1 %v3805_v0 }
  0xac   :  { %3045 = vmatpush3.bf16.msra.mxu1 %v3967_v49 }
  0xad   :  { %3070 = vmatprep.subr.bf16.mxu1 %v3805_v0 }
  0xaf   :  { %2550 = vmatmul.mubr.f32.vlgmr.msra.gmra.mrb[4].mxu1 %v148_v62  ;;  %v125_v62 = vld [vmem:[#allocation8 + $0x60] sm:$0xff] }
  0xb0   :  { %3072 = vmatpush3.bf16.msra.mxu1 %v3912_v9  ;;  %2619 = vmatprep.mubr.msk.f32.mxu1 %vm3806_vm0, %v3807_v1 }
  0xb1   :  { %3073 = vmatprep.subr.bf16.mxu1 %v3805_v0 }
  0xb4   :  { %3075 = vmatpush3.bf16.msra.mxu1 %v3919_v13 }
  0xb5   :  { %3076 = vmatprep.subr.bf16.mxu1 %v3805_v0 }
  0xb8   :  { %3078 = vmatpush3.bf16.msra.mxu1 %v3927_v19 }
  0xb9   :  { %3079 = vmatprep.subr.bf16.mxu1 %v3805_v0 }
  0xbc   :  { %3081 = vmatpush3.bf16.msra.mxu1 %v3935_v25 }
  0xbd   :  { %3082 = vmatprep.subr.bf16.mxu1 %v3805_v0 }
  0xc0   :  { %3084 = vmatpush3.bf16.msra.mxu1 %v3943_v31 }
  0xc1   :  { %3085 = vmatprep.subr.bf16.mxu1 %v3805_v0 }
  0xc4   :  { %3087 = vmatpush3.bf16.msra.mxu1 %v3951_v37 }
  0xc5   :  { %3088 = vmatprep.subr.bf16.mxu1 %v3805_v0 }
  0xc8   :  { %3090 = vmatpush3.bf16.msra.mxu1 %v3959_v43 }
  0xc9   :  { %3091 = vmatprep.subr.bf16.mxu1 %v3805_v0 }
  0xcc   :  { %3093 = vmatpush3.bf16.msra.mxu1 %v3967_v49 }
  0xcd   :  { %3118 = vmatprep.subr.bf16.mxu1 %v3805_v0 }
  0xcf   :  { %2620 = vmatmul.mubr.f32.vlgmr.msra.gmra.mrb[6].mxu1 %v149_v10 }
  0xd0   :  { %3120 = vmatpush3.bf16.msra.mxu1 %v3912_v9  ;;  %2689 = vmatprep.mubr.msk.f32.mxu1 %vm3806_vm0, %v3807_v1 }
  0xd1   :  { %3121 = vmatprep.subr.bf16.mxu1 %v3805_v0 }
  0xd4   :  { %3123 = vmatpush3.bf16.msra.mxu1 %v3919_v13 }
  0xd5   :  { %3124 = vmatprep.subr.bf16.mxu1 %v3805_v0 }
  0xd8   :  { %3126 = vmatpush3.bf16.msra.mxu1 %v3927_v19 }
  0xd9   :  { %3127 = vmatprep.subr.bf16.mxu1 %v3805_v0 }
  0xdc   :  { %3129 = vmatpush3.bf16.msra.mxu1 %v3935_v25 }
  0xdd   :  { %3130 = vmatprep.subr.bf16.mxu1 %v3805_v0 }
  0xe0   :  { %3132 = vmatpush3.bf16.msra.mxu1 %v3943_v31 }
  0xe1   :  { %3133 = vmatprep.subr.bf16.mxu1 %v3805_v0 }
  0xe4   :  { %3135 = vmatpush3.bf16.msra.mxu1 %v3951_v37 }
  0xe5   :  { %3136 = vmatprep.subr.bf16.mxu1 %v3805_v0 }
  0xe8   :  { %3138 = vmatpush3.bf16.msra.mxu1 %v3959_v43 }
  0xe9   :  { %3139 = vmatprep.subr.bf16.mxu1 %v3805_v0 }
  0xec   :  { %3141 = vmatpush3.bf16.msra.mxu1 %v3967_v49 }
  0xed   :  { %3166 = vmatprep.subr.bf16.mxu1 %v3805_v0 }
  0xef   :  { %2690 = vmatmul.mubr.f32.vlgmr.msra.gmra.mrb[8].mxu1 %v150_v22  ;;  %v134_v22 = vld [vmem:[#allocation8 + $0xa8] sm:$0xff] }
  0xf0   :  { %3168 = vmatpush3.bf16.msra.mxu1 %v3912_v9  ;;  %2759 = vmatprep.mubr.msk.f32.mxu1 %vm3806_vm0, %v3807_v1 }
  0xf1   :  { %3169 = vmatprep.subr.bf16.mxu1 %v3805_v0 }
  0xf4   :  { %3171 = vmatpush3.bf16.msra.mxu1 %v3919_v13 }
  0xf5   :  { %3172 = vmatprep.subr.bf16.mxu1 %v3805_v0 }
  0xf8   :  { %3174 = vmatpush3.bf16.msra.mxu1 %v3927_v19 }
  0xf9   :  { %3175 = vmatprep.subr.bf16.mxu1 %v3805_v0 }
  0xfc   :  { %3177 = vmatpush3.bf16.msra.mxu1 %v3935_v25 }
  0xfd   :  { %3178 = vmatprep.subr.bf16.mxu1 %v3805_v0 }
 0x100   :  { %3180 = vmatpush3.bf16.msra.mxu1 %v3943_v31 }
 0x101   :  { %3181 = vmatprep.subr.bf16.mxu1 %v3805_v0 }
 0x104   :  { %3183 = vmatpush3.bf16.msra.mxu1 %v3951_v37 }
 0x105   :  { %3184 = vmatprep.subr.bf16.mxu1 %v3805_v0 }
 0x108   :  { %3186 = vmatpush3.bf16.msra.mxu1 %v3959_v43 }
 0x109   :  { %3187 = vmatprep.subr.bf16.mxu1 %v3805_v0 }
 0x10c   :  { %3189 = vmatpush3.bf16.msra.mxu1 %v3967_v49 }
 0x10d   :  { %3214 = vmatprep.subr.bf16.mxu1 %v3805_v0 }
 0x10f   :  { %2760 = vmatmul.mubr.f32.vlgmr.msra.gmra.mrb[10].mxu1 %v151_v34  ;;  %v137_v34 = vld [vmem:[#allocation8 + $0xc0] sm:$0xff] }
 0x110   :  { %3216 = vmatpush3.bf16.msra.mxu1 %v3912_v9  ;;  %2829 = vmatprep.mubr.msk.f32.mxu1 %vm3806_vm0, %v3807_v1 }
 0x111   :  { %3217 = vmatprep.subr.bf16.mxu1 %v3805_v0 }
 0x114   :  { %3219 = vmatpush3.bf16.msra.mxu1 %v3919_v13 }
 0x115   :  { %3220 = vmatprep.subr.bf16.mxu1 %v3805_v0 }
 0x118   :  { %3222 = vmatpush3.bf16.msra.mxu1 %v3927_v19 }
 0x119   :  { %3223 = vmatprep.subr.bf16.mxu1 %v3805_v0 }
 0x11c   :  { %3225 = vmatpush3.bf16.msra.mxu1 %v3935_v25 }
 0x11d   :  { %3226 = vmatprep.subr.bf16.mxu1 %v3805_v0 }
 0x120   :  { %3228 = vmatpush3.bf16.msra.mxu1 %v3943_v31 }
 0x121   :  { %3229 = vmatprep.subr.bf16.mxu1 %v3805_v0 }
 0x124   :  { %3231 = vmatpush3.bf16.msra.mxu1 %v3951_v37 }
 0x125   :  { %3232 = vmatprep.subr.bf16.mxu1 %v3805_v0 }
 0x128   :  { %3234 = vmatpush3.bf16.msra.mxu1 %v3959_v43 }
 0x129   :  { %3235 = vmatprep.subr.bf16.mxu1 %v3805_v0 }
 0x12c   :  { %3237 = vmatpush3.bf16.msra.mxu1 %v3967_v49 }
 0x12d   :  { %3262 = vmatprep.subr.bf16.mxu1 %v3805_v0 }
 0x12f   :  { %2830 = vmatmul.mubr.f32.vlgmr.msra.gmra.mrb[12].mxu1 %v152_v46  ;;  %v143_v46 = vld [vmem:[#allocation8 + $0xf0] sm:$0xff] }
 0x130   :  { %3264 = vmatpush3.bf16.msra.mxu1 %v3912_v9  ;;  %2899 = vmatprep.mubr.msk.f32.mxu1 %vm3806_vm0, %v3807_v1 }
 0x131   :  { %3265 = vmatprep.subr.bf16.mxu1 %v3805_v0 }
 0x134   :  { %3267 = vmatpush3.bf16.msra.mxu1 %v3919_v13 }
 0x135   :  { %3268 = vmatprep.subr.bf16.mxu1 %v3805_v0 }
 0x138   :  { %3270 = vmatpush3.bf16.msra.mxu1 %v3927_v19 }
 0x139   :  { %3271 = vmatprep.subr.bf16.mxu1 %v3805_v0 }
 0x13c   :  { %3273 = vmatpush3.bf16.msra.mxu1 %v3935_v25 }
 0x13d   :  { %3274 = vmatprep.subr.bf16.mxu1 %v3805_v0 }
 0x140   :  { %3276 = vmatpush3.bf16.msra.mxu1 %v3943_v31  ;;  %v113_v31 = vld [vmem:[#allocation8] sm:$0xff] }
 0x141   :  { %v220_v52 = vpop.f32.mrb[0].mxu0  ;;  %3277 = vmatprep.subr.bf16.mxu1 %v3805_v0 }
 0x142   :  { %v290_v54 = vpop.f32.mrb[0].mxu1  ;;  %v2376_v55 = vpop.f32.mrb[1].mxu0 }
 0x143   :  { %v291_v56 = vadd.f32 %v290_v54, %v220_v52  ;;  %v2411_v57 = vpop.f32.mrb[1].mxu1  ;;  %v124_v52 = vld [vmem:[#allocation8 + $0x58] sm:$0xff] }
 0x144   :  { %3279 = vmatpush3.bf16.msra.mxu1 %v3951_v37  ;;  %v4249_v55 = vpack.c.bf16 %v124_v52, %v122_v51  ;;  %v123_v57 = vld [vmem:[#allocation8 + $0x50] sm:$0xff] }
 0x145   :  { %v300_v58 = vadd.f32 %v4032_v53, %v291_v56  ;;  %3280 = vmatprep.subr.bf16.mxu1 %v3805_v0  ;;  %v121_v56 = vld [vmem:[#allocation8 + $0x40] sm:$0xff] }
 0x147   :  { %3619 = vtanh.f32 %v300_v58  ;;  %v126_v58 = vld [vmem:[#allocation8 + $0x68] sm:$0xff] }
 0x148   :  { %3282 = vmatpush3.bf16.msra.mxu1 %v3959_v43  ;;  %v118_v43 = vld [vmem:[#allocation8 + $0x28] sm:$0xff] }
 0x149   :  { %3283 = vmatprep.subr.bf16.mxu1 %v3805_v0 }
 0x14c   :  { %3285 = vmatpush3.bf16.msra.mxu1 %v3967_v49  ;;  %v120_v49 = vld [vmem:[#allocation8 + $0x38] sm:$0xff] }
 0x151   :  { %v3620_v59 = vpop.eup %3619 }
 0x152   :  { %2445 = vmatmul.mubr.f32.vlgmr.msra.gmra.mrb[2].mxu0 %v3620_v59  ;;  %v128_v59 = vld [vmem:[#allocation8 + $0x78] sm:$0xff] }
 0x153   :  { %3000 = vmatpush3.bf16.msra.mxu0 %v3910_v5  ;;  %2514 = vmatprep.mubr.msk.f32.mxu0 %vm3806_vm0, %v3807_v1 }
 0x154   :  { %3001 = vmatprep.subr.bf16.mxu0 %v3805_v0 }
 0x157   :  { %3003 = vmatpush3.bf16.msra.mxu0 %v3915_v12 }
 0x158   :  { %3004 = vmatprep.subr.bf16.mxu0 %v3805_v0 }
 0x15b   :  { %3006 = vmatpush3.bf16.msra.mxu0 %v3923_v18 }
 0x15c   :  { %3007 = vmatprep.subr.bf16.mxu0 %v3805_v0 }
 0x15f   :  { %3009 = vmatpush3.bf16.msra.mxu0 %v3931_v24 }
 0x160   :  { %3010 = vmatprep.subr.bf16.mxu0 %v3805_v0 }
 0x162   :  { %v438_v60 = vpop.f32.mrb[2].mxu1 }
 0x163   :  { %3012 = vmatpush3.bf16.msra.mxu0 %v3939_v30  ;;  %v2481_v61 = vpop.f32.mrb[3].mxu1 }
 0x164   :  { %3013 = vmatprep.subr.bf16.mxu0 %v3805_v0  ;;  %v4255_v61 = vpack.c.bf16 %v128_v59, %v126_v58 }
 0x167   :  { %3015 = vmatpush3.bf16.msra.mxu0 %v3947_v36 }
 0x168   :  { %3016 = vmatprep.subr.bf16.mxu0 %v3805_v0 }
 0x16b   :  { %3018 = vmatpush3.bf16.msra.mxu0 %v3955_v42 }
 0x16c   :  { %3019 = vmatprep.subr.bf16.mxu0 %v3805_v0 }
 0x16f   :  { %3021 = vmatpush3.bf16.msra.mxu0 %v3963_v48 }
 0x170   :  { %3046 = vmatprep.subr.bf16.mxu0 %v3805_v0 }
 0x182   :  { %v580_v7 = vpop.f32.mrb[4].mxu1 }
 0x183   :  { %v2551_v8 = vpop.f32.mrb[5].mxu1 }
 0x1a2   :  { %v722_v20 = vpop.f32.mrb[6].mxu1 }
 0x1a3   :  { %v2621_v21 = vpop.f32.mrb[7].mxu1 }
 0x1c2   :  { %v864_v32 = vpop.f32.mrb[8].mxu1 }
 0x1c3   :  { %v2691_v33 = vpop.f32.mrb[9].mxu1 }
 0x1c4   :  { %v140_v33 = vld [vmem:[#allocation8 + $0xd8] sm:$0xff] }
 0x1e2   :  { %v1006_v44 = vpop.f32.mrb[10].mxu1 }
 0x1e3   :  { %v2761_v45 = vpop.f32.mrb[11].mxu1 }
 0x1e4   :  { %v141_v45 = vld [vmem:[#allocation8 + $0xe0] sm:$0xff] }
 0x225   :  { %v368_v63 = vpop.f32.mrb[2].mxu0 }
 0x226   :  { %v439_v2 = vadd.f32 %v438_v60, %v368_v63  ;;  %v2446_v3 = vpop.f32.mrb[3].mxu0  ;;  %v4253_v60 = vpack.c.bf16 %v123_v57, %v121_v56  ;;  %v127_v63 = vld [vmem:[#allocation8 + $0x70] sm:$0xff] }
 0x228   :  { %v442_v4 = vadd.f32 %v4032_v53, %v439_v2  ;;  %v4259_v2 = vpack.c.bf16 %v127_v63, %v125_v62 }
 0x22a   :  { %3621 = vtanh.f32 %v442_v4 }
 0x234   :  { %v3622_v6 = vpop.eup %3621 }
 0x235   :  { %2515 = vmatmul.mubr.f32.vlgmr.msra.gmra.mrb[4].mxu0 %v3622_v6 }
 0x236   :  { %3048 = vmatpush3.bf16.msra.mxu0 %v3910_v5  ;;  %2584 = vmatprep.mubr.msk.f32.mxu0 %vm3806_vm0, %v3807_v1 }
 0x237   :  { %3049 = vmatprep.subr.bf16.mxu0 %v3805_v0 }
 0x23a   :  { %3051 = vmatpush3.bf16.msra.mxu0 %v3915_v12 }
 0x23b   :  { %3052 = vmatprep.subr.bf16.mxu0 %v3805_v0 }
 0x23e   :  { %3054 = vmatpush3.bf16.msra.mxu0 %v3923_v18 }
 0x23f   :  { %3055 = vmatprep.subr.bf16.mxu0 %v3805_v0 }
 0x242   :  { %3057 = vmatpush3.bf16.msra.mxu0 %v3931_v24 }
 0x243   :  { %3058 = vmatprep.subr.bf16.mxu0 %v3805_v0 }
 0x246   :  { %3060 = vmatpush3.bf16.msra.mxu0 %v3939_v30 }
 0x247   :  { %3061 = vmatprep.subr.bf16.mxu0 %v3805_v0 }
 0x24a   :  { %3063 = vmatpush3.bf16.msra.mxu0 %v3947_v36 }
 0x24b   :  { %3064 = vmatprep.subr.bf16.mxu0 %v3805_v0 }
 0x24e   :  { %3066 = vmatpush3.bf16.msra.mxu0 %v3955_v42 }
 0x24f   :  { %3067 = vmatprep.subr.bf16.mxu0 %v3805_v0 }
 0x252   :  { %3069 = vmatpush3.bf16.msra.mxu0 %v3963_v48 }
 0x253   :  { %3094 = vmatprep.subr.bf16.mxu0 %v3805_v0 }
 0x308   :  { %v510_v11 = vpop.f32.mrb[4].mxu0 }
 0x309   :  { %v581_v14 = vadd.f32 %v580_v7, %v510_v11  ;;  %v2516_v15 = vpop.f32.mrb[5].mxu0 }
 0x30a   :  { %v132_v15 = vld [vmem:[#allocation8 + $0x98] sm:$0xff] }
 0x30b   :  { %v584_v16 = vadd.f32 %v4032_v53, %v581_v14  ;;  %v130_v14 = vld [vmem:[#allocation8 + $0x88] sm:$0xff] }
 0x30d   :  { %3623 = vtanh.f32 %v584_v16  ;;  %v4271_v16 = vpack.c.bf16 %v132_v15, %v130_v14 }
 0x317   :  { %v3624_v17 = vpop.eup %3623 }
 0x318   :  { %2585 = vmatmul.mubr.f32.vlgmr.msra.gmra.mrb[6].mxu0 %v3624_v17  ;;  %v129_v17 = vld [vmem:[#allocation8 + $0x80] sm:$0xff] }
 0x319   :  { %3096 = vmatpush3.bf16.msra.mxu0 %v3910_v5  ;;  %2654 = vmatprep.mubr.msk.f32.mxu0 %vm3806_vm0, %v3807_v1 }
 0x31a   :  { %3097 = vmatprep.subr.bf16.mxu0 %v3805_v0 }
 0x31d   :  { %3099 = vmatpush3.bf16.msra.mxu0 %v3915_v12 }
 0x31e   :  { %3100 = vmatprep.subr.bf16.mxu0 %v3805_v0 }
 0x321   :  { %3102 = vmatpush3.bf16.msra.mxu0 %v3923_v18 }
 0x322   :  { %3103 = vmatprep.subr.bf16.mxu0 %v3805_v0 }
 0x325   :  { %3105 = vmatpush3.bf16.msra.mxu0 %v3931_v24 }
 0x326   :  { %3106 = vmatprep.subr.bf16.mxu0 %v3805_v0 }
 0x329   :  { %3108 = vmatpush3.bf16.msra.mxu0 %v3939_v30 }
 0x32a   :  { %3109 = vmatprep.subr.bf16.mxu0 %v3805_v0 }
 0x32d   :  { %3111 = vmatpush3.bf16.msra.mxu0 %v3947_v36 }
 0x32e   :  { %3112 = vmatprep.subr.bf16.mxu0 %v3805_v0 }
 0x331   :  { %3114 = vmatpush3.bf16.msra.mxu0 %v3955_v42 }
 0x332   :  { %3115 = vmatprep.subr.bf16.mxu0 %v3805_v0 }
 0x335   :  { %3117 = vmatpush3.bf16.msra.mxu0 %v3963_v48 }
 0x336   :  { %3142 = vmatprep.subr.bf16.mxu0 %v3805_v0 }
 0x3eb   :  { %v652_v23 = vpop.f32.mrb[6].mxu0 }
 0x3ec   :  { %v723_v26 = vadd.f32 %v722_v20, %v652_v23  ;;  %v2586_v27 = vpop.f32.mrb[7].mxu0  ;;  %v131_v20 = vld [vmem:[#allocation8 + $0x90] sm:$0xff]  ;;  %v136_v23 = vld [vmem:[#allocation8 + $0xb8] sm:$0xff] }
 0x3ed   :  { %v4273_v21 = vpack.c.bf16 %v131_v20, %v129_v17  ;;  %v133_v27 = vld [vmem:[#allocation8 + $0xa0] sm:$0xff] }
 0x3ee   :  { %v726_v28 = vadd.f32 %v4032_v53, %v723_v26  ;;  %v4279_v26 = vpack.c.bf16 %v136_v23, %v134_v22 }
 0x3f0   :  { %3625 = vtanh.f32 %v726_v28  ;;  %v135_v28 = vld [vmem:[#allocation8 + $0xb0] sm:$0xff] }
 0x3fa   :  { %v3626_v29 = vpop.eup %3625 }
 0x3fb   :  { %2655 = vmatmul.mubr.f32.vlgmr.msra.gmra.mrb[8].mxu0 %v3626_v29  ;;  %v4281_v29 = vpack.c.bf16 %v135_v28, %v133_v27 }
 0x3fc   :  { %3144 = vmatpush3.bf16.msra.mxu0 %v3910_v5  ;;  %2724 = vmatprep.mubr.msk.f32.mxu0 %vm3806_vm0, %v3807_v1 }
 0x3fd   :  { %3145 = vmatprep.subr.bf16.mxu0 %v3805_v0 }
 0x400   :  { %3147 = vmatpush3.bf16.msra.mxu0 %v3915_v12 }
 0x401   :  { %3148 = vmatprep.subr.bf16.mxu0 %v3805_v0 }
 0x404   :  { %3150 = vmatpush3.bf16.msra.mxu0 %v3923_v18 }
 0x405   :  { %3151 = vmatprep.subr.bf16.mxu0 %v3805_v0 }
 0x408   :  { %3153 = vmatpush3.bf16.msra.mxu0 %v3931_v24 }
 0x409   :  { %3154 = vmatprep.subr.bf16.mxu0 %v3805_v0 }
 0x40c   :  { %3156 = vmatpush3.bf16.msra.mxu0 %v3939_v30 }
 0x40d   :  { %3157 = vmatprep.subr.bf16.mxu0 %v3805_v0 }
 0x410   :  { %3159 = vmatpush3.bf16.msra.mxu0 %v3947_v36 }
 0x411   :  { %3160 = vmatprep.subr.bf16.mxu0 %v3805_v0 }
 0x414   :  { %3162 = vmatpush3.bf16.msra.mxu0 %v3955_v42 }
 0x415   :  { %3163 = vmatprep.subr.bf16.mxu0 %v3805_v0 }
 0x418   :  { %3165 = vmatpush3.bf16.msra.mxu0 %v3963_v48 }
 0x419   :  { %3190 = vmatprep.subr.bf16.mxu0 %v3805_v0 }
 0x4ce   :  { %v794_v35 = vpop.f32.mrb[8].mxu0 }
 0x4cf   :  { %v865_v38 = vadd.f32 %v864_v32, %v794_v35  ;;  %v2656_v39 = vpop.f32.mrb[9].mxu0  ;;  %v138_v32 = vld [vmem:[#allocation8 + $0xc8] sm:$0xff] }
 0x4d0   :  { %v4287_v35 = vpack.c.bf16 %v140_v33, %v138_v32  ;;  %v142_v39 = vld [vmem:[#allocation8 + $0xe8] sm:$0xff] }
 0x4d1   :  { %v868_v40 = vadd.f32 %v4032_v53, %v865_v38  ;;  %v139_v38 = vld [vmem:[#allocation8 + $0xd0] sm:$0xff] }
 0x4d3   :  { %3627 = vtanh.f32 %v868_v40  ;;  %v144_v40 = vld [vmem:[#allocation8 + $0xf8] sm:$0xff] }
 0x4dd   :  { %v3628_v41 = vpop.eup %3627 }
 0x4de   :  { %2725 = vmatmul.mubr.f32.vlgmr.msra.gmra.mrb[10].mxu0 %v3628_v41  ;;  %v4289_v41 = vpack.c.bf16 %v139_v38, %v137_v34 }
 0x4df   :  { %3192 = vmatpush3.bf16.msra.mxu0 %v3910_v5  ;;  %2794 = vmatprep.mubr.msk.f32.mxu0 %vm3806_vm0, %v3807_v1 }
 0x4e0   :  { %3193 = vmatprep.subr.bf16.mxu0 %v3805_v0 }
 0x4e3   :  { %3195 = vmatpush3.bf16.msra.mxu0 %v3915_v12 }
 0x4e4   :  { %3196 = vmatprep.subr.bf16.mxu0 %v3805_v0 }
 0x4e7   :  { %3198 = vmatpush3.bf16.msra.mxu0 %v3923_v18 }
 0x4e8   :  { %3199 = vmatprep.subr.bf16.mxu0 %v3805_v0 }
 0x4eb   :  { %3201 = vmatpush3.bf16.msra.mxu0 %v3931_v24 }
 0x4ec   :  { %3202 = vmatprep.subr.bf16.mxu0 %v3805_v0 }
 0x4ef   :  { %3204 = vmatpush3.bf16.msra.mxu0 %v3939_v30 }
 0x4f0   :  { %3205 = vmatprep.subr.bf16.mxu0 %v3805_v0 }
 0x4f3   :  { %3207 = vmatpush3.bf16.msra.mxu0 %v3947_v36 }
 0x4f4   :  { %3208 = vmatprep.subr.bf16.mxu0 %v3805_v0 }
 0x4f7   :  { %3210 = vmatpush3.bf16.msra.mxu0 %v3955_v42 }
 0x4f8   :  { %3211 = vmatprep.subr.bf16.mxu0 %v3805_v0 }
 0x4fb   :  { %3213 = vmatpush3.bf16.msra.mxu0 %v3963_v48 }
 0x4fc   :  { %3238 = vmatprep.subr.bf16.mxu0 %v3805_v0 }
 0x5b1   :  { %v936_v9 = vpop.f32.mrb[10].mxu0 }
 0x5b2   :  { %v1007_v13 = vadd.f32 %v1006_v44, %v936_v9  ;;  %v2726_v19 = vpop.f32.mrb[11].mxu0  ;;  %v4291_v44 = vpack.c.bf16 %v144_v40, %v142_v39  ;;  %v4296_v9 = vpack.c.bf16 %v143_v46, %v141_v45 }
 0x5b4   :  { %v1010_v25 = vadd.f32 %v4032_v53, %v1007_v13 }
 0x5b6   :  { %3629 = vtanh.f32 %v1010_v25 }
 0x5c0   :  { %v3630_v47 = vpop.eup %3629 }
 0x5c1   :  { %2795 = vmatmul.mubr.f32.vlgmr.msra.gmra.mrb[12].mxu0 %v3630_v47 }
 0x5c2   :  { %3240 = vmatpush3.bf16.msra.mxu0 %v3910_v5  ;;  %2864 = vmatprep.mubr.msk.f32.mxu0 %vm3806_vm0, %v3807_v1  ;;  %v1148_v5 = vpop.f32.mrb[12].mxu1 }
 0x5c3   :  { %3241 = vmatprep.subr.bf16.mxu0 %v3805_v0 }
 0x5c6   :  { %3243 = vmatpush3.bf16.msra.mxu0 %v3915_v12  ;;  %v2831_v12 = vpop.f32.mrb[13].mxu1 }
 0x5c7   :  { %3244 = vmatprep.subr.bf16.mxu0 %v3805_v0 }
 0x5ca   :  { %3246 = vmatpush3.bf16.msra.mxu0 %v3923_v18  ;;  %v153_v18 = vld [vmem:[#allocation2 + $0x38] sm:$0xff] }
 0x5cb   :  { %3247 = vmatprep.subr.bf16.mxu0 %v3805_v0  ;;  %2900 = vmatmul.mubr.f32.vlgmr.msra.gmra.mrb[14].mxu1 %v153_v18 }
 0x5cc   :  { %1444 = vmatprep.mubr.f32.mxu1 %v3807_v1 }
 0x5ce   :  { %3249 = vmatpush3.bf16.msra.mxu0 %v3931_v24  ;;  %v114_v24 = vld [vmem:[#allocation8 + $0x8] sm:$0xff] }
 0x5cf   :  { %3250 = vmatprep.subr.bf16.mxu0 %v3805_v0 }
 0x5d2   :  { %3252 = vmatpush3.bf16.msra.mxu0 %v3939_v30  ;;  %v116_v30 = vld [vmem:[#allocation8 + $0x18] sm:$0xff] }
 0x5d3   :  { %3253 = vmatprep.subr.bf16.mxu0 %v3805_v0  ;;  %v4237_v37 = vpack.c.bf16 %v116_v30, %v114_v24  ;;  %v145_v24 = vld [vmem:[%s4496_s5] sm:$0x3]  ;;  %s3808_s5 = smov [#allocation10]  }
 0x5d4   :  { %s2044_s28 = sshll.u32 %s3808_s5, 4  ;;  %s2045_s28 = int_to_ptr.vmem [resolvable:$true] %s2044_s28 }
 0x5d5   :  { %3319 = vmatprep.subr.bf16.mxu1 %v4237_v37  ;;  %s3743_s29 = scalar_lea.vmem %s2045_s28, 1280  ;;  %p3748_p5 = scmp.lt.s32.totalorder %s2045_s28, %s2045_s28 }
 0x5d6   :  { %3255 = vmatpush3.bf16.msra.mxu0 %v3947_v36  ;;  %v115_v36 = vld [vmem:[#allocation8 + $0x10] sm:$0xff]  ;;  %p3744_p4 = scmp.ne.s32.totalorder %s2045_s28, %s3743_s29  ;;  %p3749_p6 = scmp.lt.s32.totalorder %s3743_s29, %s3743_s29 }
 0x5d7   :  { %3256 = vmatprep.subr.bf16.mxu0 %v3805_v0  ;;  %v4239_v50 = vpack.c.bf16 %v115_v36, %v113_v31 }
 0x5d8   :  { %p3750_p7 = por %p3749_p6, %p3748_p5 }
 0x5d9   :  { %3321 = vmatpush1.bf16.msra.mxu1 %v4239_v50 }
 0x5da   :  { %3258 = vmatpush3.bf16.msra.mxu0 %v3955_v42  ;;  %v117_v42 = vld [vmem:[#allocation8 + $0x20] sm:$0xff]  ;;  %p3751_p8 = pnand %p3750_p7, %p3744_p4 }
 0x5db   :  { %3259 = vmatprep.subr.bf16.mxu0 %v3805_v0  ;;  %v4242_v0 = vpack.c.bf16 %v120_v49, %v118_v43 }
 0x5dd   :  { %3323 = vmatprep.subr.bf16.mxu1 %v4242_v0 }
 0x5de   :  { %3261 = vmatpush3.bf16.msra.mxu0 %v3963_v48  ;;  %v119_v48 = vld [vmem:[#allocation8 + $0x30] sm:$0xff] }
 0x5df   :  { %3287 = vmatprep.subr.bf16.mxu0 %v4237_v37  ;;  %v4247_v54 = vpack.c.bf16 %v119_v48, %v117_v42 }
 0x5e1   :  { %3325 = vmatpush1.bf16.msra.mxu1 %v4247_v54 }
 0x5e2   :  { %3327 = vmatprep.subr.bf16.mxu1 %v4249_v55 }
 0x5e5   :  { %3329 = vmatpush1.bf16.msra.mxu1 %v4253_v60 }
 0x5e6   :  { %3331 = vmatprep.subr.bf16.mxu1 %v4255_v61 }
 0x5e9   :  { %3333 = vmatpush1.bf16.msra.mxu1 %v4259_v2 }
 0x5ea   :  { %3335 = vmatprep.subr.bf16.mxu1 %v4271_v16 }
 0x5ed   :  { %3337 = vmatpush1.bf16.msra.mxu1 %v4273_v21 }
 0x5ee   :  { %3339 = vmatprep.subr.bf16.mxu1 %v4279_v26 }
 0x5f1   :  { %3341 = vmatpush1.bf16.msra.mxu1 %v4281_v29 }
 0x5f2   :  { %3343 = vmatprep.subr.bf16.mxu1 %v4287_v35 }
 0x5f5   :  { %3345 = vmatpush1.bf16.msra.mxu1 %v4289_v41 }
 0x5f6   :  { %3347 = vmatprep.subr.bf16.mxu1 %v4291_v44 }
 0x5f9   :  { %3349 = vmatpush1.bf16.msra.mxu1 %v4296_v9 }
 0x5fa   :  { %3383 = vmatprep.subr.bf16.mxu1 %v4237_v37 }
 0x694   :  { %v1078_v3 = vpop.f32.mrb[12].mxu0 }
 0x695   :  { %v1149_v4 = vadd.f32 %v1148_v5, %v1078_v3  ;;  %v2796_v6 = vpop.f32.mrb[13].mxu0 }
 0x697   :  { %v1152_v7 = vadd.f32 %v4032_v53, %v1149_v4 }
 0x699   :  { %3631 = vtanh.f32 %v1152_v7 }
 0x69e   :  { %v1290_v10 = vpop.f32.mrb[14].mxu1 }
 0x69f   :  { %v2901_v11 = vpop.f32.mrb[15].mxu1 }
 0x6a3   :  { %v3632_v8 = vpop.eup %3631 }
 0x6a4   :  { %2865 = vmatmul.mubr.f32.vlgmr.msra.gmra.mrb[14].mxu0 %v3632_v8 }
 0x6a5   :  { %3289 = vmatpush1.bf16.msra.mxu0 %v4239_v50  ;;  %1371 = vmatprep.mubr.f32.mxu0 %v3807_v1 }
 0x6a6   :  { %3291 = vmatprep.subr.bf16.mxu0 %v4242_v0 }
 0x6a9   :  { %3293 = vmatpush1.bf16.msra.mxu0 %v4247_v54 }
 0x6aa   :  { %3295 = vmatprep.subr.bf16.mxu0 %v4249_v55 }
 0x6ad   :  { %3297 = vmatpush1.bf16.msra.mxu0 %v4253_v60 }
 0x6ae   :  { %3299 = vmatprep.subr.bf16.mxu0 %v4255_v61 }
 0x6b1   :  { %3301 = vmatpush1.bf16.msra.mxu0 %v4259_v2 }
 0x6b2   :  { %3303 = vmatprep.subr.bf16.mxu0 %v4271_v16 }
 0x6b5   :  { %3305 = vmatpush1.bf16.msra.mxu0 %v4273_v21 }
 0x6b6   :  { %3307 = vmatprep.subr.bf16.mxu0 %v4279_v26 }
 0x6b9   :  { %3309 = vmatpush1.bf16.msra.mxu0 %v4281_v29 }
 0x6ba   :  { %3311 = vmatprep.subr.bf16.mxu0 %v4287_v35 }
 0x6bd   :  { %3313 = vmatpush1.bf16.msra.mxu0 %v4289_v41 }
 0x6be   :  { %3315 = vmatprep.subr.bf16.mxu0 %v4291_v44 }
 0x6c1   :  { %3317 = vmatpush1.bf16.msra.mxu0 %v4296_v9 }
 0x6c2   :  { %3351 = vmatprep.subr.bf16.mxu0 %v4237_v37 }
 0x777   :  { %v1220_v13 = vpop.f32.mrb[14].mxu0 }
 0x778   :  { %v1291_v19 = vadd.f32 %v1290_v10, %v1220_v13  ;;  %v2866_v25 = vpop.f32.mrb[15].mxu0 }
 0x77a   :  { %v1294_v47 = vadd.f32 %v4032_v53, %v1291_v19  ;;  %v1297_v53 = vlaneseq }
 0x77c   :  { %3633 = vtanh.f32 %v1294_v47  ;;  %v1298_v12 = vshrl.u32 %v1297_v53, 7 }
 0x77e   :  { %v1299_v18 = vsub.s32 0, %v1298_v12  ;;  %v1303_v30 = vsub.s32 1, %v1298_v12 }
 0x780   :  { %v4326_v31 = vrot.slane %v145_v24, %v1299_v18  ;;  %v4328_v36 = vrot.slane %v145_v24, %v1303_v30 }
 0x786   :  { %v3634_v5 = vpop.eup %3633 }
 0x787   :  { %1372 = vmatmul.mubr.f32.vlgmr.msra.gmra.mrb[16].mxu0 %v3634_v5 }
 0x788   :  { %3353 = vmatpush1.bf16.msra.mxu0 %v4239_v50  ;;  %1517 = vmatprep.mubr.f32.mxu0 %v3807_v1 }
 0x789   :  { %3355 = vmatprep.subr.bf16.mxu0 %v4242_v0 }
 0x78c   :  { %3357 = vmatpush1.bf16.msra.mxu0 %v4247_v54 }
 0x78d   :  { %3359 = vmatprep.subr.bf16.mxu0 %v4249_v55 }
 0x790   :  { %3361 = vmatpush1.bf16.msra.mxu0 %v4253_v60 }
 0x791   :  { %3363 = vmatprep.subr.bf16.mxu0 %v4255_v61 }
 0x794   :  { %3365 = vmatpush1.bf16.msra.mxu0 %v4259_v2 }
 0x795   :  { %3367 = vmatprep.subr.bf16.mxu0 %v4271_v16 }
 0x798   :  { %3369 = vmatpush1.bf16.msra.mxu0 %v4273_v21 }
 0x799   :  { %3371 = vmatprep.subr.bf16.mxu0 %v4279_v26 }
 0x79c   :  { %3373 = vmatpush1.bf16.msra.mxu0 %v4281_v29 }
 0x79d   :  { %3375 = vmatprep.subr.bf16.mxu0 %v4287_v35 }
 0x7a0   :  { %3377 = vmatpush1.bf16.msra.mxu0 %v4289_v41 }
 0x7a1   :  { %3379 = vmatprep.subr.bf16.mxu0 %v4291_v44 }
 0x7a4   :  { %3381 = vmatpush1.bf16.msra.mxu0 %v4296_v9 }
 0x7a5   :  { %3415 = vmatprep.subr.bf16.mxu0 %v4237_v37 }
 0x85a   :  { %v1373_v43 = vpop.f32.mrb[16].mxu0 }
 0x85b   :  { %v1374_v49 = vadd.f32 %v1373_v43, %v4326_v31  ;;  %v1375_v42 = vpop.f32.mrb[17].mxu0 }
 0x85c   :  { %v1376_v48 = vadd.f32 %v1375_v42, %v4328_v36 }
 0x85d   :  { %1378 = vst [vmem:[#allocation10] sm:$0xff] %v1374_v49 }
 0x85e   :  { %3635 = vtanh.f32 %v1376_v48 }
 0x868   :  { %v3636_v51 = vpop.eup %3635 }
 0x869   :  { %1445 = vmatmul.mubr.f32.vlgmr.msra.gmra.mrb[16].mxu1 %v3636_v51 }
 0x86a   :  { %3385 = vmatpush1.bf16.msra.mxu1 %v4239_v50  ;;  %1590 = vmatprep.mubr.f32.mxu1 %v3807_v1 }
 0x86b   :  { %3387 = vmatprep.subr.bf16.mxu1 %v4242_v0 }
 0x86e   :  { %3389 = vmatpush1.bf16.msra.mxu1 %v4247_v54 }
 0x86f   :  { %3391 = vmatprep.subr.bf16.mxu1 %v4249_v55 }
 0x872   :  { %3393 = vmatpush1.bf16.msra.mxu1 %v4253_v60 }
 0x873   :  { %3395 = vmatprep.subr.bf16.mxu1 %v4255_v61 }
 0x876   :  { %3397 = vmatpush1.bf16.msra.mxu1 %v4259_v2 }
 0x877   :  { %3399 = vmatprep.subr.bf16.mxu1 %v4271_v16 }
 0x87a   :  { %3401 = vmatpush1.bf16.msra.mxu1 %v4273_v21 }
 0x87b   :  { %3403 = vmatprep.subr.bf16.mxu1 %v4279_v26 }
 0x87e   :  { %3405 = vmatpush1.bf16.msra.mxu1 %v4281_v29 }
 0x87f   :  { %3407 = vmatprep.subr.bf16.mxu1 %v4287_v35 }
 0x882   :  { %3409 = vmatpush1.bf16.msra.mxu1 %v4289_v41 }
 0x883   :  { %3411 = vmatprep.subr.bf16.mxu1 %v4291_v44 }
 0x886   :  { %3413 = vmatpush1.bf16.msra.mxu1 %v4296_v9 }
 0x887   :  { %3447 = vmatprep.subr.bf16.mxu1 %v4237_v37 }
 0x93c   :  { %v1446_v52 = vpop.f32.mrb[16].mxu1 }
 0x93d   :  { %v1447_v56 = vadd.f32 %v1446_v52, %v4326_v31  ;;  %v1448_v57 = vpop.f32.mrb[17].mxu1 }
 0x93e   :  { %v1449_v58 = vadd.f32 %v1448_v57, %v4328_v36 }
 0x93f   :  { %1451 = vst [vmem:[#allocation10 + $0x8] sm:$0xff] %v1447_v56 }
 0x940   :  { %3637 = vtanh.f32 %v1449_v58 }
 0x94a   :  { %v3638_v59 = vpop.eup %3637 }
 0x94b   :  { %1518 = vmatmul.mubr.f32.vlgmr.msra.gmra.mrb[18].mxu0 %v3638_v59 }
 0x94c   :  { %3417 = vmatpush1.bf16.msra.mxu0 %v4239_v50  ;;  %1663 = vmatprep.mubr.f32.mxu0 %v3807_v1 }
 0x94d   :  { %3419 = vmatprep.subr.bf16.mxu0 %v4242_v0 }
 0x950   :  { %3421 = vmatpush1.bf16.msra.mxu0 %v4247_v54 }
 0x951   :  { %3423 = vmatprep.subr.bf16.mxu0 %v4249_v55 }
 0x954   :  { %3425 = vmatpush1.bf16.msra.mxu0 %v4253_v60 }
 0x955   :  { %3427 = vmatprep.subr.bf16.mxu0 %v4255_v61 }
 0x958   :  { %3429 = vmatpush1.bf16.msra.mxu0 %v4259_v2 }
 0x959   :  { %3431 = vmatprep.subr.bf16.mxu0 %v4271_v16 }
 0x95c   :  { %3433 = vmatpush1.bf16.msra.mxu0 %v4273_v21 }
 0x95d   :  { %3435 = vmatprep.subr.bf16.mxu0 %v4279_v26 }
 0x960   :  { %3437 = vmatpush1.bf16.msra.mxu0 %v4281_v29 }
 0x961   :  { %3439 = vmatprep.subr.bf16.mxu0 %v4287_v35 }
 0x964   :  { %3441 = vmatpush1.bf16.msra.mxu0 %v4289_v41 }
 0x965   :  { %3443 = vmatprep.subr.bf16.mxu0 %v4291_v44 }
 0x968   :  { %3445 = vmatpush1.bf16.msra.mxu0 %v4296_v9 }
 0x969   :  { %3479 = vmatprep.subr.bf16.mxu0 %v4237_v37 }
 0xa1e   :  { %v1519_v62 = vpop.f32.mrb[18].mxu0 }
 0xa1f   :  { %v1520_v63 = vadd.f32 %v1519_v62, %v4326_v31  ;;  %v1521_v3 = vpop.f32.mrb[19].mxu0 }
 0xa20   :  { %v1522_v4 = vadd.f32 %v1521_v3, %v4328_v36 }
 0xa21   :  { %1524 = vst [vmem:[#allocation10 + $0x10] sm:$0xff] %v1520_v63 }
 0xa22   :  { %3639 = vtanh.f32 %v1522_v4 }
 0xa2c   :  { %v3640_v6 = vpop.eup %3639 }
 0xa2d   :  { %1591 = vmatmul.mubr.f32.vlgmr.msra.gmra.mrb[18].mxu1 %v3640_v6 }
 0xa2e   :  { %3449 = vmatpush1.bf16.msra.mxu1 %v4239_v50  ;;  %1736 = vmatprep.mubr.f32.mxu1 %v3807_v1 }
 0xa2f   :  { %3451 = vmatprep.subr.bf16.mxu1 %v4242_v0 }
 0xa32   :  { %3453 = vmatpush1.bf16.msra.mxu1 %v4247_v54 }
 0xa33   :  { %3455 = vmatprep.subr.bf16.mxu1 %v4249_v55 }
 0xa36   :  { %3457 = vmatpush1.bf16.msra.mxu1 %v4253_v60 }
 0xa37   :  { %3459 = vmatprep.subr.bf16.mxu1 %v4255_v61 }
 0xa3a   :  { %3461 = vmatpush1.bf16.msra.mxu1 %v4259_v2 }
 0xa3b   :  { %3463 = vmatprep.subr.bf16.mxu1 %v4271_v16 }
 0xa3e   :  { %3465 = vmatpush1.bf16.msra.mxu1 %v4273_v21 }
 0xa3f   :  { %3467 = vmatprep.subr.bf16.mxu1 %v4279_v26 }
 0xa42   :  { %3469 = vmatpush1.bf16.msra.mxu1 %v4281_v29 }
 0xa43   :  { %3471 = vmatprep.subr.bf16.mxu1 %v4287_v35 }
 0xa46   :  { %3473 = vmatpush1.bf16.msra.mxu1 %v4289_v41 }
 0xa47   :  { %3475 = vmatprep.subr.bf16.mxu1 %v4291_v44 }
 0xa4a   :  { %3477 = vmatpush1.bf16.msra.mxu1 %v4296_v9 }
 0xa4b   :  { %3511 = vmatprep.subr.bf16.mxu1 %v4237_v37 }
 0xb00   :  { %v1592_v7 = vpop.f32.mrb[18].mxu1 }
 0xb01   :  { %v1593_v8 = vadd.f32 %v1592_v7, %v4326_v31  ;;  %v1594_v10 = vpop.f32.mrb[19].mxu1 }
 0xb02   :  { %v1595_v11 = vadd.f32 %v1594_v10, %v4328_v36 }
 0xb03   :  { %1597 = vst [vmem:[#allocation10 + $0x18] sm:$0xff] %v1593_v8 }
 0xb04   :  { %3641 = vtanh.f32 %v1595_v11 }
 0xb0e   :  { %v3642_v14 = vpop.eup %3641 }
 0xb0f   :  { %1664 = vmatmul.mubr.f32.vlgmr.msra.gmra.mrb[20].mxu0 %v3642_v14 }
 0xb10   :  { %3481 = vmatpush1.bf16.msra.mxu0 %v4239_v50  ;;  %1809 = vmatprep.mubr.f32.mxu0 %v3807_v1 }
 0xb11   :  { %3483 = vmatprep.subr.bf16.mxu0 %v4242_v0 }
 0xb14   :  { %3485 = vmatpush1.bf16.msra.mxu0 %v4247_v54 }
 0xb15   :  { %3487 = vmatprep.subr.bf16.mxu0 %v4249_v55 }
 0xb18   :  { %3489 = vmatpush1.bf16.msra.mxu0 %v4253_v60 }
 0xb19   :  { %3491 = vmatprep.subr.bf16.mxu0 %v4255_v61 }
 0xb1c   :  { %3493 = vmatpush1.bf16.msra.mxu0 %v4259_v2 }
 0xb1d   :  { %3495 = vmatprep.subr.bf16.mxu0 %v4271_v16 }
 0xb20   :  { %3497 = vmatpush1.bf16.msra.mxu0 %v4273_v21 }
 0xb21   :  { %3499 = vmatprep.subr.bf16.mxu0 %v4279_v26 }
 0xb24   :  { %3501 = vmatpush1.bf16.msra.mxu0 %v4281_v29 }
 0xb25   :  { %3503 = vmatprep.subr.bf16.mxu0 %v4287_v35 }
 0xb28   :  { %3505 = vmatpush1.bf16.msra.mxu0 %v4289_v41 }
 0xb29   :  { %3507 = vmatprep.subr.bf16.mxu0 %v4291_v44 }
 0xb2c   :  { %3509 = vmatpush1.bf16.msra.mxu0 %v4296_v9 }
 0xb2d   :  { %3543 = vmatprep.subr.bf16.mxu0 %v4237_v37 }
 0xbe2   :  { %v1665_v15 = vpop.f32.mrb[20].mxu0 }
 0xbe3   :  { %v1666_v17 = vadd.f32 %v1665_v15, %v4326_v31  ;;  %v1667_v20 = vpop.f32.mrb[21].mxu0 }
 0xbe4   :  { %v1668_v22 = vadd.f32 %v1667_v20, %v4328_v36 }
 0xbe5   :  { %1670 = vst [vmem:[#allocation10 + $0x20] sm:$0xff] %v1666_v17 }
 0xbe6   :  { %3643 = vtanh.f32 %v1668_v22 }
 0xbf0   :  { %v3644_v23 = vpop.eup %3643 }
 0xbf1   :  { %1737 = vmatmul.mubr.f32.vlgmr.msra.gmra.mrb[20].mxu1 %v3644_v23 }
 0xbf2   :  { %3513 = vmatpush1.bf16.msra.mxu1 %v4239_v50  ;;  %1882 = vmatprep.mubr.f32.mxu1 %v3807_v1 }
 0xbf3   :  { %3515 = vmatprep.subr.bf16.mxu1 %v4242_v0 }
 0xbf6   :  { %3517 = vmatpush1.bf16.msra.mxu1 %v4247_v54 }
 0xbf7   :  { %3519 = vmatprep.subr.bf16.mxu1 %v4249_v55 }
 0xbfa   :  { %3521 = vmatpush1.bf16.msra.mxu1 %v4253_v60 }
 0xbfb   :  { %3523 = vmatprep.subr.bf16.mxu1 %v4255_v61 }
 0xbfe   :  { %3525 = vmatpush1.bf16.msra.mxu1 %v4259_v2 }
 0xbff   :  { %3527 = vmatprep.subr.bf16.mxu1 %v4271_v16 }
 0xc02   :  { %3529 = vmatpush1.bf16.msra.mxu1 %v4273_v21 }
 0xc03   :  { %3531 = vmatprep.subr.bf16.mxu1 %v4279_v26 }
 0xc06   :  { %3533 = vmatpush1.bf16.msra.mxu1 %v4281_v29 }
 0xc07   :  { %3535 = vmatprep.subr.bf16.mxu1 %v4287_v35 }
 0xc0a   :  { %3537 = vmatpush1.bf16.msra.mxu1 %v4289_v41 }
 0xc0b   :  { %3539 = vmatprep.subr.bf16.mxu1 %v4291_v44 }
 0xc0e   :  { %3541 = vmatpush1.bf16.msra.mxu1 %v4296_v9 }
 0xc0f   :  { %3575 = vmatprep.subr.bf16.mxu1 %v4237_v37 }
 0xcc4   :  { %v1738_v27 = vpop.f32.mrb[20].mxu1 }
 0xcc5   :  { %v1739_v28 = vadd.f32 %v1738_v27, %v4326_v31  ;;  %v1740_v32 = vpop.f32.mrb[21].mxu1 }
 0xcc6   :  { %v1741_v33 = vadd.f32 %v1740_v32, %v4328_v36 }
 0xcc7   :  { %1743 = vst [vmem:[#allocation10 + $0x28] sm:$0xff] %v1739_v28 }
 0xcc8   :  { %3645 = vtanh.f32 %v1741_v33 }
 0xcd2   :  { %v3646_v34 = vpop.eup %3645 }
 0xcd3   :  { %1810 = vmatmul.mubr.f32.vlgmr.msra.gmra.mrb[22].mxu0 %v3646_v34 }
 0xcd4   :  { %3545 = vmatpush1.bf16.msra.mxu0 %v4239_v50  ;;  %1955 = vmatprep.mubr.f32.mxu0 %v3807_v1 }
 0xcd5   :  { %3547 = vmatprep.subr.bf16.mxu0 %v4242_v0 }
 0xcd8   :  { %3549 = vmatpush1.bf16.msra.mxu0 %v4247_v54 }
 0xcd9   :  { %3551 = vmatprep.subr.bf16.mxu0 %v4249_v55 }
 0xcdc   :  { %3553 = vmatpush1.bf16.msra.mxu0 %v4253_v60 }
 0xcdd   :  { %3555 = vmatprep.subr.bf16.mxu0 %v4255_v61 }
 0xce0   :  { %3557 = vmatpush1.bf16.msra.mxu0 %v4259_v2 }
 0xce1   :  { %3559 = vmatprep.subr.bf16.mxu0 %v4271_v16 }
 0xce4   :  { %3561 = vmatpush1.bf16.msra.mxu0 %v4273_v21 }
 0xce5   :  { %3563 = vmatprep.subr.bf16.mxu0 %v4279_v26 }
 0xce8   :  { %3565 = vmatpush1.bf16.msra.mxu0 %v4281_v29 }
 0xce9   :  { %3567 = vmatprep.subr.bf16.mxu0 %v4287_v35 }
 0xcec   :  { %3569 = vmatpush1.bf16.msra.mxu0 %v4289_v41 }
 0xced   :  { %3571 = vmatprep.subr.bf16.mxu0 %v4291_v44 }
 0xcf0   :  { %3573 = vmatpush1.bf16.msra.mxu0 %v4296_v9 }
 0xda6   :  { %v1811_v37 = vpop.f32.mrb[22].mxu0 }
 0xda7   :  { %v1812_v38 = vadd.f32 %v1811_v37, %v4326_v31  ;;  %v1813_v39 = vpop.f32.mrb[23].mxu0 }
 0xda8   :  { %v1814_v40 = vadd.f32 %v1813_v39, %v4328_v36 }
 0xda9   :  { %1816 = vst [vmem:[#allocation10 + $0x30] sm:$0xff] %v1812_v38 }
 0xdaa   :  { %3647 = vtanh.f32 %v1814_v40 }
 0xdb4   :  { %v3648_v45 = vpop.eup %3647 }
 0xdb5   :  { %1883 = vmatmul.mubr.f32.vlgmr.msra.gmra.mrb[22].mxu1 %v3648_v45 }
 0xdb6   :  { %3577 = vmatpush1.bf16.msra.mxu1 %v4239_v50  ;;  %2028 = vmatprep.mubr.f32.mxu1 %v3807_v1 }
 0xdb7   :  { %3579 = vmatprep.subr.bf16.mxu1 %v4242_v0 }
 0xdba   :  { %3581 = vmatpush1.bf16.msra.mxu1 %v4247_v54 }
 0xdbb   :  { %3583 = vmatprep.subr.bf16.mxu1 %v4249_v55 }
 0xdbe   :  { %3585 = vmatpush1.bf16.msra.mxu1 %v4253_v60 }
 0xdbf   :  { %3587 = vmatprep.subr.bf16.mxu1 %v4255_v61 }
 0xdc2   :  { %3589 = vmatpush1.bf16.msra.mxu1 %v4259_v2 }
 0xdc3   :  { %3591 = vmatprep.subr.bf16.mxu1 %v4271_v16 }
 0xdc6   :  { %3593 = vmatpush1.bf16.msra.mxu1 %v4273_v21 }
 0xdc7   :  { %3595 = vmatprep.subr.bf16.mxu1 %v4279_v26 }
 0xdca   :  { %3597 = vmatpush1.bf16.msra.mxu1 %v4281_v29 }
 0xdcb   :  { %3599 = vmatprep.subr.bf16.mxu1 %v4287_v35 }
 0xdce   :  { %3601 = vmatpush1.bf16.msra.mxu1 %v4289_v41 }
 0xdcf   :  { %3603 = vmatprep.subr.bf16.mxu1 %v4291_v44 }
 0xdd2   :  { %3605 = vmatpush1.bf16.msra.mxu1 %v4296_v9 }
 0xe88   :  { %v1884_v1 = vpop.f32.mrb[22].mxu1 }
 0xe89   :  { %v1885_v50 = vadd.f32 %v1884_v1, %v4326_v31  ;;  %v1886_v0 = vpop.f32.mrb[23].mxu1 }
 0xe8a   :  { %v1887_v54 = vadd.f32 %v1886_v0, %v4328_v36 }
 0xe8b   :  { %1889 = vst [vmem:[#allocation10 + $0x38] sm:$0xff] %v1885_v50 }
 0xe8c   :  { %3649 = vtanh.f32 %v1887_v54 }
 0xe96   :  { %v3650_v55 = vpop.eup %3649 }
 0xe97   :  { %1956 = vmatmul.mubr.f32.vlgmr.msra.gmra.mrb[24].mxu0 %v3650_v55 }
 0xf6a   :  { %v1957_v60 = vpop.f32.mrb[24].mxu0 }
 0xf6b   :  { %v1958_v61 = vadd.f32 %v1957_v60, %v4326_v31  ;;  %v1959_v2 = vpop.f32.mrb[25].mxu0 }
 0xf6c   :  { %v1960_v16 = vadd.f32 %v1959_v2, %v4328_v36 }
 0xf6d   :  { %1962 = vst [vmem:[#allocation10 + $0x40] sm:$0xff] %v1958_v61 }
 0xf6e   :  { %3651 = vtanh.f32 %v1960_v16 }
 0xf78   :  { %v3652_v21 = vpop.eup %3651 }
 0xf79   :  { %2029 = vmatmul.mubr.f32.vlgmr.msra.gmra.mrb[24].mxu1 %v3652_v21 }
0x104c   :  { %v2030_v26 = vpop.f32.mrb[24].mxu1 }
0x104d   :  { %v2031_v29 = vadd.f32 %v2030_v26, %v4326_v31  ;;  %v2032_v35 = vpop.f32.mrb[25].mxu1 }
0x104e   :  { %v2033_v41 = vadd.f32 %v2032_v35, %v4328_v36 }
0x104f   :  { %2035 = vst [vmem:[#allocation10 + $0x48] sm:$0xff] %v2031_v29 }
0x1050   :  { %3653 = vtanh.f32 %v2033_v41 }
0x1051   :  { %3754 = shalt.err (!%p3751_p8)
}
0x1052   :  { %s3755_s9 = scalar_lea.hbm %s4497_s6, 1280 }
0x1053   :  { %p3756_p9 = scmp.ne.s32.totalorder %s4497_s6, %s3755_s9  ;;  %p3759_p10 = scmp.lt.u32.totalorder %s3755_s9, %s4497_s6 }
0x1055   :  { %p3761_p11 = pnand %p3759_p10, %p3756_p9 }
0x1057   :  { %3764 = shalt.err (!%p3761_p11)
}
0x1058   :  { %2047 = dma.vmem_to_hbm [thread:$0]  %s2045_s28, 1280, %s4497_s6, [#allocation4]  }
0x1059   :  { %s3809_s17 = smov [#allocation11]  }
0x105a   :  { %s2054_s19 = sshll.u32 %s3809_s17, 4  ;;  %v3654_v44 = vpop.eup %3653  ;;  %s2055_s19 = int_to_ptr.vmem [resolvable:$true] %s2054_s19 }
0x105b   :  { %2037 = vst [vmem:[#allocation11] sm:$0xff] %v3654_v44  ;;  %s3765_s20 = scalar_lea.vmem %s2055_s19, 128  ;;  %p3770_p13 = scmp.lt.s32.totalorder %s2055_s19, %s2055_s19 }
0x105c   :  { %p3766_p12 = scmp.ne.s32.totalorder %s2055_s19, %s3765_s20  ;;  %p3771_p0 = scmp.lt.s32.totalorder %s3765_s20, %s3765_s20 }
0x105e   :  { %p3772_p1 = por %p3771_p0, %p3770_p13 }
0x1060   :  { %p3773_p2 = pnand %p3772_p1, %p3766_p12 }
0x1062   :  { %3776 = shalt.err (!%p3773_p2)
}
0x1063   :  { %s3777_s23 = scalar_lea.hbm %s4498_s7, 128 }
0x1064   :  { %p3778_p3 = scmp.ne.s32.totalorder %s4498_s7, %s3777_s23  ;;  %p3781_p4 = scmp.lt.u32.totalorder %s3777_s23, %s4498_s7 }
0x1066   :  { %p3783_p5 = pnand %p3781_p4, %p3778_p3 }
0x1068   :  { %3786 = shalt.err (!%p3783_p5)
}
0x1069   :  { %2057 = dma.vmem_to_hbm [thread:$0]  %s2055_s19, 128, %s4498_s7, [#allocation12]  }
0x106a   :  { %3793 = dma.done.wait [#allocation4], 1280  }
0x106b   :  { %3794 = vsyncadd [#allocation4], 4294966016 }
0x106c   :  { %3795 = dma.done.wait [#allocation12], 128  }
0x106d   :  { %3796 = vsyncadd [#allocation12], 4294967168 }
0x106e   :  { %2064 = vsyncpa [#allocation3], 1 }
0x106f   :  { %2065 = vsyncpa [#allocation6], 1 }
0x1070   :  { %2066 = vsyncpa [#allocation9], 1 }
0x1071   :  { %2067 = vsyncpa [#allocation4], 1 }
0x1072   :  { %2068 = vsyncpa [#allocation12], 1 }

</bundles_post_ra>
